<compile_context>
chip_gen: v7x
topology: tpu7x:2x2x1
jax: 0.10.0
libtpu: 0.0.40
codegen_flags: <defaults>
</compile_context>

<pallas_src>
import jax
import jax.numpy as jnp
import numpy as np
from jax.experimental import pallas as pl
from jax.experimental.pallas import tpu as pltpu


def _pick_bt(n):
    # Output block is (bt, 10): bt must be a multiple of 8 or equal to the full batch.
    # Prefer tiles that keep the grid length >= 2 (megacore) and the VMEM footprint
    # per step around ~17 MB at bt=64 (safe on v7x's 64 MiB VMEM).
    for b in (64, 32, 16, 8):
        if b < n and n % b == 0:
            return b
    return n


# ---------------- fused Pallas kernel ----------------

def _fused_cnn_kernel(x_ref, w1_ref, b1_ref, w2_ref, b2_ref, wf_ref, msel_ref, ffold_ref,
                      bf_ref, o_ref, z1_acc, h1_buf, z2_acc, h2_buf):
    bt = x_ref.shape[0]

    # ---- layer 1: conv(1->10, k=5) + maxpool(2) + relu -------------------------------
    # 5 row-tap matmuls; output lane = v*128 + bo*10 + c  (v = horizontal-pool parity).
    z1_acc[...] = jnp.dot(x_ref[:, 0:40, :].reshape(bt * 40, 28), w1_ref[0],
                          preferred_element_type=jnp.float32)
    for di in range(1, 5):
        z1_acc[...] += jnp.dot(x_ref[:, di:di + 40, :].reshape(bt * 40, 28), w1_ref[di],
                               preferred_element_type=jnp.float32)
    # horizontal 2-pool = max of the two lane-tile halves (tile-aligned slices)
    hpool = jnp.maximum(z1_acc[:, 0:128], z1_acc[:, 128:256]).reshape(bt, 40, 128)
    # vertical 2-pool = max of row r and row r+1; relu(maxpool(x)+b) == relu(maxpool(x+b))
    h1 = jnp.maximum(jnp.maximum(hpool[:, 0:39, :], hpool[:, 1:40, :])
                     + b1_ref[...].reshape(1, 1, 128), 0.0)
    # valid h1 data sits at even rows (row 2a <-> pooled row a); odd rows are harmless junk
    h1_buf[:, 0:39, :] = h1

    # ---- layer 2: conv(10->20, k=5) + maxpool(2) + relu ------------------------------
    # 5 row-tap matmuls with K=128 (all 10 input channels x 12 pooled columns, banded);
    # output lane = v*128 + bo2*20 + co.
    z2_acc[...] = jnp.dot(h1_buf[:, 0:24, :].reshape(bt * 24, 128), w2_ref[0],
                          preferred_element_type=jnp.float32)
    for di in range(1, 5):
        z2_acc[...] += jnp.dot(h1_buf[:, 2 * di:2 * di + 24, :].reshape(bt * 24, 128),
                               w2_ref[di], preferred_element_type=jnp.float32)
    h2_buf[...] = jnp.maximum(z2_acc[:, 0:128], z2_acc[:, 128:256]).reshape(bt, 24, 128)
    # vertical 2-pool pairs rows (r, r+2) because conv2 rows live at even indices
    h2 = jnp.maximum(jnp.maximum(h2_buf[:, 0:16, :], h2_buf[:, 2:18, :])
                     + b2_ref[...].reshape(1, 1, 128), 0.0)
    # valid pooled data: rows {0, 4, 8, 12} (= pooled row ao), lanes bo2*20 + co

    # ---- fc(320 -> 10) ---------------------------------------------------------------
    # one wide matmul per (row, ao-hypothesis); Msel keeps only row 4*ao for hypothesis ao,
    # Ffold sums the 4 per-ao partial logit blocks.
    pl3 = jnp.dot(h2.reshape(bt * 16, 128), wf_ref[...],
                  preferred_element_type=jnp.float32).reshape(bt, 16, 40)
    s = jnp.sum(pl3 * msel_ref[...].reshape(1, 16, 40), axis=1)
    o_ref[...] = jnp.dot(s, ffold_ref[...], preferred_element_type=jnp.float32) + bf_ref[...]


def fused_simple_cnn(xp, banded, n, bt):
    w1b, b1lane, w2b, b2lane, wfwide, msel, ffold, bfv = banded
    return pl.pallas_call(
        _fused_cnn_kernel,
        out_shape=jax.ShapeDtypeStruct((n, 10), jnp.float32),
        grid=(n // bt,),
        in_specs=[
            pl.BlockSpec((bt, 48, 28), lambda i: (i, 0, 0)),
            pl.BlockSpec((5, 28, 256), lambda i: (0, 0, 0)),
            pl.BlockSpec((1, 128), lambda i: (0, 0)),
            pl.BlockSpec((5, 128, 256), lambda i: (0, 0, 0)),
            pl.BlockSpec((1, 128), lambda i: (0, 0)),
            pl.BlockSpec((128, 40), lambda i: (0, 0)),
            pl.BlockSpec((16, 40), lambda i: (0, 0)),
            pl.BlockSpec((40, 10), lambda i: (0, 0)),
            pl.BlockSpec((1, 10), lambda i: (0, 0)),
        ],
        out_specs=pl.BlockSpec((bt, 10), lambda i: (i, 0)),
        scratch_shapes=[
            pltpu.VMEM((bt * 40, 256), jnp.float32),   # conv1 banded-matmul accumulator
            pltpu.VMEM((bt, 40, 128), jnp.float32),    # pooled+relu'd h1 slab
            pltpu.VMEM((bt * 24, 256), jnp.float32),   # conv2 banded-matmul accumulator
            pltpu.VMEM((bt, 24, 128), jnp.float32),    # horizontally-pooled conv2 slab
        ],
        compiler_params=pltpu.CompilerParams(
            dimension_semantics=("parallel",),
            vmem_limit_bytes=48 * 1024 * 1024,
        ),
    )(xp, w1b, b1lane, w2b, b2lane, wfwide, msel, ffold, bfv)


# ---------------- host-side parameter / input packing (tiny, one-off glue) ----------------

def _prepare_banded_params(params):
    # Builds the banded weight matrices with numpy (runs eagerly, not under jit).
    w1, b1, w2, b2, wf, bf = (np.asarray(p, np.float32) for p in params)

    # conv1: W1b[di][jj, v*128 + bo*10 + c] = w1[c, 0, di, jj - (2*bo + v)]
    w1b = np.zeros((5, 28, 2, 128), np.float32)
    w1r = w1.reshape(10, 5, 5)                        # (c, di, dj)
    for di in range(5):
        for dj in range(5):
            for v in range(2):
                for bo in range(12):
                    w1b[di, 2 * bo + v + dj, v, bo * 10:bo * 10 + 10] = w1r[:, di, dj]
    w1b = w1b.reshape(5, 28, 256)
    b1lane = np.zeros((1, 128), np.float32)
    for bo in range(12):
        b1lane[0, bo * 10:bo * 10 + 10] = b1

    # conv2: W2b[di][bo*10 + ci, v*128 + bo2*20 + co] = w2[co, ci, di, bo - (2*bo2 + v)]
    w2b = np.zeros((5, 128, 2, 128), np.float32)
    for di in range(5):
        for dj in range(5):
            for v in range(2):
                for bo2 in range(4):
                    bo = 2 * bo2 + v + dj
                    w2b[di, bo * 10:bo * 10 + 10, v, bo2 * 20:bo2 * 20 + 20] = w2[:, :, di, dj].T
    w2b = w2b.reshape(5, 128, 256)
    b2lane = np.zeros((1, 128), np.float32)
    for bo2 in range(4):
        b2lane[0, bo2 * 20:bo2 * 20 + 20] = b2

    # fc: torch flattens (N, 20, 4, 4) channel-major -> feature f = co*16 + ao*4 + bo2
    wfwide = np.zeros((128, 40), np.float32)
    for ao in range(4):
        for bo2 in range(4):
            for co in range(20):
                wfwide[bo2 * 20 + co, ao * 10:ao * 10 + 10] = wf[:, co * 16 + ao * 4 + bo2]
    msel = np.zeros((16, 40), np.float32)
    for ao in range(4):
        msel[4 * ao, ao * 10:ao * 10 + 10] = 1.0
    ffold = np.tile(np.eye(10, dtype=np.float32), (4, 1))          # (40, 10)
    bfv = bf.reshape(1, 10)

    return tuple(jnp.asarray(a) for a in
                 (w1b, b1lane, w2b, b2lane, wfwide, msel, ffold, bfv))


def _prep_input(x):
    # (N, 1, 28, 28) -> (N, 48, 28): squeeze channel, zero-pad rows so every in-kernel
    # 40-row window is in bounds.  ~1.7x the raw image (vs ~24x for HBM im2col).
    n = x.shape[0]
    return jnp.pad(x.reshape(n, 28, 28), ((0, 0), (0, 20), (0, 0)))


def init_params(key):
    k1, k2, k3, k4, k5, k6 = jax.random.split(key, 6)
    w1 = 0.1 * jax.random.normal(k1, (10, 1, 5, 5), jnp.float32)   # conv1 weight (OIHW)
    b1 = 0.1 * jax.random.normal(k2, (10,), jnp.float32)
    w2 = 0.1 * jax.random.normal(k3, (20, 10, 5, 5), jnp.float32)  # conv2 weight (OIHW)
    b2 = 0.1 * jax.random.normal(k4, (20,), jnp.float32)
    wf = 0.1 * jax.random.normal(k5, (10, 320), jnp.float32)       # fc weight (out, in)
    bf = 0.1 * jax.random.normal(k6, (10,), jnp.float32)
    return w1, b1, w2, b2, wf, bf


def simple_cnn_forward(x, params):
    n = x.shape[0]
    xp = _prep_input(x)
    banded = _prepare_banded_params(params)
    bt = _pick_bt(n)
    return fused_simple_cnn(xp, banded, n, bt)


def reference_forward(x, params):
    w1, b1, w2, b2, wf, bf = params

    def conv(x, w, b):
        y = jax.lax.conv_general_dilated(
            x, w, window_strides=(1, 1), padding="VALID",
            dimension_numbers=("NCHW", "OIHW", "NCHW"))
        return y + b[None, :, None, None]

    def mp(x):
        return jax.lax.reduce_window(x, -jnp.inf, jax.lax.max,
                                     (1, 1, 2, 2), (1, 1, 2, 2), "VALID")

    h = jax.nn.relu(mp(conv(x, w1, b1)))
    h = jax.nn.relu(mp(conv(h, w2, b2)))
    h = h.reshape(x.shape[0], -1)
    return h @ wf.T + bf


if __name__ == "__main__":
    key = jax.random.PRNGKey(0)
    kx, kp = jax.random.split(key)
    # fc expects 20*4*4 = 320 features, which pins the spatial size to 28x28 (MNIST).
    x = jax.random.normal(kx, (2, 1, 28, 28), jnp.float32)
    params = init_params(kp)

    out = simple_cnn_forward(x, params)
    out = jax.block_until_ready(out)

    ref = reference_forward(x, params)
    assert out.shape == (2, 10)
    np.testing.assert_allclose(np.asarray(out), np.asarray(ref), rtol=1e-4, atol=1e-4)
    print("KERNEL_OK")
</pallas_src>

<mosaic_0001>
module attributes {stable_mosaic.version = 11 : i64} {
  func.func @_fused_cnn_kernel(%arg0: i32, %arg1: memref<2x48x28xf32, #tpu.memory_space<vmem>>, %arg2: memref<5x28x256xf32, #tpu.memory_space<vmem>>, %arg3: memref<1x128xf32, #tpu.memory_space<vmem>>, %arg4: memref<5x128x256xf32, #tpu.memory_space<vmem>>, %arg5: memref<1x128xf32, #tpu.memory_space<vmem>>, %arg6: memref<128x40xf32, #tpu.memory_space<vmem>>, %arg7: memref<16x40xf32, #tpu.memory_space<vmem>>, %arg8: memref<40x10xf32, #tpu.memory_space<vmem>>, %arg9: memref<1x10xf32, #tpu.memory_space<vmem>>, %arg10: memref<2x10xf32, #tpu.memory_space<vmem>>, %arg11: memref<80x256xf32, #tpu.memory_space<vmem>>, %arg12: memref<2x40x128xf32, #tpu.memory_space<vmem>>, %arg13: memref<48x256xf32, #tpu.memory_space<vmem>>, %arg14: memref<2x24x128xf32, #tpu.memory_space<vmem>>) attributes {dimension_semantics = [#tpu.dimension_semantics<parallel>], iteration_bounds = array<i64: 1>, scalar_prefetch = 0 : i64, scratch_operands = 4 : i64, tpu.core_type = #tpu.core_type<tc>, window_params = [{transform_indices = @transform_0, window_bounds = array<i64: 2, 48, 28>}, {pipeline_mode = #tpu.pipeline_mode<synchronous>, transform_indices = @transform_1, window_bounds = array<i64: 5, 28, 256>}, {pipeline_mode = #tpu.pipeline_mode<synchronous>, transform_indices = @transform_2, window_bounds = array<i64: 1, 128>}, {pipeline_mode = #tpu.pipeline_mode<synchronous>, transform_indices = @transform_3, window_bounds = array<i64: 5, 128, 256>}, {pipeline_mode = #tpu.pipeline_mode<synchronous>, transform_indices = @transform_4, window_bounds = array<i64: 1, 128>}, {pipeline_mode = #tpu.pipeline_mode<synchronous>, transform_indices = @transform_5, window_bounds = array<i64: 128, 40>}, {pipeline_mode = #tpu.pipeline_mode<synchronous>, transform_indices = @transform_6, window_bounds = array<i64: 16, 40>}, {pipeline_mode = #tpu.pipeline_mode<synchronous>, transform_indices = @transform_7, window_bounds = array<i64: 40, 10>}, {pipeline_mode = #tpu.pipeline_mode<synchronous>, transform_indices = @transform_8, window_bounds = array<i64: 1, 10>}, {transform_indices = @transform_9, window_bounds = array<i64: 2, 10>}]} {
    %c0 = arith.constant 0 : index
    %c0_0 = arith.constant 0 : index
    %c0_1 = arith.constant 0 : index
    %0 = vector.load %arg1[%c0, %c0_0, %c0_1] : memref<2x48x28xf32, #tpu.memory_space<vmem>>, vector<2x40x28xf32>
    %1 = vector.shape_cast %0 : vector<2x40x28xf32> to vector<80x28xf32>
    %c0_2 = arith.constant 0 : index
    %c0_3 = arith.constant 0 : index
    %c0_4 = arith.constant 0 : index
    %2 = vector.load %arg2[%c0_2, %c0_3, %c0_4] : memref<5x28x256xf32, #tpu.memory_space<vmem>>, vector<1x28x256xf32>
    %3 = vector.shape_cast %2 : vector<1x28x256xf32> to vector<28x256xf32>
    %cst = arith.constant dense<0.000000e+00> : vector<80x256xf32>
    %4 = tpu.matmul %1, %3, %cst {dimension_numbers = #tpu.dot_dimension_numbers<[1], [0], [0], [1], [0, 0, 1, 1], [], []>} : vector<80x28xf32>, vector<28x256xf32>, vector<80x256xf32> -> vector<80x256xf32>
    %c0_5 = arith.constant 0 : index
    %c0_6 = arith.constant 0 : index
    %5 = vector.load %arg11[%c0_5, %c0_6] : memref<80x256xf32, #tpu.memory_space<vmem>>, vector<80x256xf32>
    tpu.vector_store %arg11[%c0_5, %c0_6], %4 {strides = array<i32>} : memref<80x256xf32, #tpu.memory_space<vmem>>, vector<80x256xf32>,
    %c0_7 = arith.constant 0 : index
    %c0_8 = arith.constant 0 : index
    %6 = vector.load %arg11[%c0_7, %c0_8] : memref<80x256xf32, #tpu.memory_space<vmem>>, vector<80x256xf32>
    %c0_9 = arith.constant 0 : index
    %c1 = arith.constant 1 : index
    %c0_10 = arith.constant 0 : index
    %7 = vector.load %arg1[%c0_9, %c1, %c0_10] : memref<2x48x28xf32, #tpu.memory_space<vmem>>, vector<2x40x28xf32>
    %8 = vector.shape_cast %7 : vector<2x40x28xf32> to vector<80x28xf32>
    %c1_11 = arith.constant 1 : index
    %c0_12 = arith.constant 0 : index
    %c0_13 = arith.constant 0 : index
    %9 = vector.load %arg2[%c1_11, %c0_12, %c0_13] : memref<5x28x256xf32, #tpu.memory_space<vmem>>, vector<1x28x256xf32>
    %10 = vector.shape_cast %9 : vector<1x28x256xf32> to vector<28x256xf32>
    %cst_14 = arith.constant dense<0.000000e+00> : vector<80x256xf32>
    %11 = tpu.matmul %8, %10, %cst_14 {dimension_numbers = #tpu.dot_dimension_numbers<[1], [0], [0], [1], [0, 0, 1, 1], [], []>} : vector<80x28xf32>, vector<28x256xf32>, vector<80x256xf32> -> vector<80x256xf32>
    %12 = arith.addf %6, %11 : vector<80x256xf32>
    %c0_15 = arith.constant 0 : index
    %c0_16 = arith.constant 0 : index
    %13 = vector.load %arg11[%c0_15, %c0_16] : memref<80x256xf32, #tpu.memory_space<vmem>>, vector<80x256xf32>
    tpu.vector_store %arg11[%c0_15, %c0_16], %12 {strides = array<i32>} : memref<80x256xf32, #tpu.memory_space<vmem>>, vector<80x256xf32>,
    %c0_17 = arith.constant 0 : index
    %c0_18 = arith.constant 0 : index
    %14 = vector.load %arg11[%c0_17, %c0_18] : memref<80x256xf32, #tpu.memory_space<vmem>>, vector<80x256xf32>
    %c0_19 = arith.constant 0 : index
    %c2 = arith.constant 2 : index
    %c0_20 = arith.constant 0 : index
    %15 = vector.load %arg1[%c0_19, %c2, %c0_20] : memref<2x48x28xf32, #tpu.memory_space<vmem>>, vector<2x40x28xf32>
    %16 = vector.shape_cast %15 : vector<2x40x28xf32> to vector<80x28xf32>
    %c2_21 = arith.constant 2 : index
    %c0_22 = arith.constant 0 : index
    %c0_23 = arith.constant 0 : index
    %17 = vector.load %arg2[%c2_21, %c0_22, %c0_23] : memref<5x28x256xf32, #tpu.memory_space<vmem>>, vector<1x28x256xf32>
    %18 = vector.shape_cast %17 : vector<1x28x256xf32> to vector<28x256xf32>
    %cst_24 = arith.constant dense<0.000000e+00> : vector<80x256xf32>
    %19 = tpu.matmul %16, %18, %cst_24 {dimension_numbers = #tpu.dot_dimension_numbers<[1], [0], [0], [1], [0, 0, 1, 1], [], []>} : vector<80x28xf32>, vector<28x256xf32>, vector<80x256xf32> -> vector<80x256xf32>
    %20 = arith.addf %14, %19 : vector<80x256xf32>
    %c0_25 = arith.constant 0 : index
    %c0_26 = arith.constant 0 : index
    %21 = vector.load %arg11[%c0_25, %c0_26] : memref<80x256xf32, #tpu.memory_space<vmem>>, vector<80x256xf32>
    tpu.vector_store %arg11[%c0_25, %c0_26], %20 {strides = array<i32>} : memref<80x256xf32, #tpu.memory_space<vmem>>, vector<80x256xf32>,
    %c0_27 = arith.constant 0 : index
    %c0_28 = arith.constant 0 : index
    %22 = vector.load %arg11[%c0_27, %c0_28] : memref<80x256xf32, #tpu.memory_space<vmem>>, vector<80x256xf32>
    %c0_29 = arith.constant 0 : index
    %c3 = arith.constant 3 : index
    %c0_30 = arith.constant 0 : index
    %23 = vector.load %arg1[%c0_29, %c3, %c0_30] : memref<2x48x28xf32, #tpu.memory_space<vmem>>, vector<2x40x28xf32>
    %24 = vector.shape_cast %23 : vector<2x40x28xf32> to vector<80x28xf32>
    %c3_31 = arith.constant 3 : index
    %c0_32 = arith.constant 0 : index
    %c0_33 = arith.constant 0 : index
    %25 = vector.load %arg2[%c3_31, %c0_32, %c0_33] : memref<5x28x256xf32, #tpu.memory_space<vmem>>, vector<1x28x256xf32>
    %26 = vector.shape_cast %25 : vector<1x28x256xf32> to vector<28x256xf32>
    %cst_34 = arith.constant dense<0.000000e+00> : vector<80x256xf32>
    %27 = tpu.matmul %24, %26, %cst_34 {dimension_numbers = #tpu.dot_dimension_numbers<[1], [0], [0], [1], [0, 0, 1, 1], [], []>} : vector<80x28xf32>, vector<28x256xf32>, vector<80x256xf32> -> vector<80x256xf32>
    %28 = arith.addf %22, %27 : vector<80x256xf32>
    %c0_35 = arith.constant 0 : index
    %c0_36 = arith.constant 0 : index
    %29 = vector.load %arg11[%c0_35, %c0_36] : memref<80x256xf32, #tpu.memory_space<vmem>>, vector<80x256xf32>
    tpu.vector_store %arg11[%c0_35, %c0_36], %28 {strides = array<i32>} : memref<80x256xf32, #tpu.memory_space<vmem>>, vector<80x256xf32>,
    %c0_37 = arith.constant 0 : index
    %c0_38 = arith.constant 0 : index
    %30 = vector.load %arg11[%c0_37, %c0_38] : memref<80x256xf32, #tpu.memory_space<vmem>>, vector<80x256xf32>
    %c0_39 = arith.constant 0 : index
    %c4 = arith.constant 4 : index
    %c0_40 = arith.constant 0 : index
    %31 = vector.load %arg1[%c0_39, %c4, %c0_40] : memref<2x48x28xf32, #tpu.memory_space<vmem>>, vector<2x40x28xf32>
    %32 = vector.shape_cast %31 : vector<2x40x28xf32> to vector<80x28xf32>
    %c4_41 = arith.constant 4 : index
    %c0_42 = arith.constant 0 : index
    %c0_43 = arith.constant 0 : index
    %33 = vector.load %arg2[%c4_41, %c0_42, %c0_43] : memref<5x28x256xf32, #tpu.memory_space<vmem>>, vector<1x28x256xf32>
    %34 = vector.shape_cast %33 : vector<1x28x256xf32> to vector<28x256xf32>
    %cst_44 = arith.constant dense<0.000000e+00> : vector<80x256xf32>
    %35 = tpu.matmul %32, %34, %cst_44 {dimension_numbers = #tpu.dot_dimension_numbers<[1], [0], [0], [1], [0, 0, 1, 1], [], []>} : vector<80x28xf32>, vector<28x256xf32>, vector<80x256xf32> -> vector<80x256xf32>
    %36 = arith.addf %30, %35 : vector<80x256xf32>
    %c0_45 = arith.constant 0 : index
    %c0_46 = arith.constant 0 : index
    %37 = vector.load %arg11[%c0_45, %c0_46] : memref<80x256xf32, #tpu.memory_space<vmem>>, vector<80x256xf32>
    tpu.vector_store %arg11[%c0_45, %c0_46], %36 {strides = array<i32>} : memref<80x256xf32, #tpu.memory_space<vmem>>, vector<80x256xf32>,
    %c0_47 = arith.constant 0 : index
    %c0_48 = arith.constant 0 : index
    %38 = vector.load %arg11[%c0_47, %c0_48] : memref<80x256xf32, #tpu.memory_space<vmem>>, vector<80x128xf32>
    %c0_49 = arith.constant 0 : index
    %c128 = arith.constant 128 : index
    %39 = vector.load %arg11[%c0_49, %c128] : memref<80x256xf32, #tpu.memory_space<vmem>>, vector<80x128xf32>
    %40 = arith.maximumf %38, %39 : vector<80x128xf32>
    %41 = vector.shape_cast %40 : vector<80x128xf32> to vector<2x40x128xf32>
    %42 = vector.extract_strided_slice %41 {offsets = [0, 0, 0], sizes = [2, 39, 128], strides = [1, 1, 1]} : vector<2x40x128xf32> to vector<2x39x128xf32>
    %43 = vector.extract_strided_slice %41 {offsets = [0, 1, 0], sizes = [2, 39, 128], strides = [1, 1, 1]} : vector<2x40x128xf32> to vector<2x39x128xf32>
    %44 = arith.maximumf %42, %43 : vector<2x39x128xf32>
    %c0_50 = arith.constant 0 : index
    %c0_51 = arith.constant 0 : index
    %45 = vector.load %arg3[%c0_50, %c0_51] : memref<1x128xf32, #tpu.memory_space<vmem>>, vector<1x128xf32>
    %46 = vector.shape_cast %45 : vector<1x128xf32> to vector<1x1x128xf32>
    %47 = vector.broadcast %46 : vector<1x1x128xf32> to vector<2x39x128xf32>
    %48 = arith.addf %44, %47 : vector<2x39x128xf32>
    %cst_52 = arith.constant 0.000000e+00 : f32
    %49 = vector.broadcast %cst_52 : f32 to vector<2x39x128xf32>
    %50 = arith.maximumf %48, %49 : vector<2x39x128xf32>
    %c0_53 = arith.constant 0 : index
    %c0_54 = arith.constant 0 : index
    %c0_55 = arith.constant 0 : index
    %51 = vector.load %arg12[%c0_53, %c0_54, %c0_55] : memref<2x40x128xf32, #tpu.memory_space<vmem>>, vector<2x39x128xf32>
    tpu.vector_store %arg12[%c0_53, %c0_54, %c0_55], %50 {strides = array<i32>} : memref<2x40x128xf32, #tpu.memory_space<vmem>>, vector<2x39x128xf32>,
    %c0_56 = arith.constant 0 : index
    %c0_57 = arith.constant 0 : index
    %c0_58 = arith.constant 0 : index
    %52 = vector.load %arg12[%c0_56, %c0_57, %c0_58] : memref<2x40x128xf32, #tpu.memory_space<vmem>>, vector<2x24x128xf32>
    %53 = vector.shape_cast %52 : vector<2x24x128xf32> to vector<48x128xf32>
    %c0_59 = arith.constant 0 : index
    %c0_60 = arith.constant 0 : index
    %c0_61 = arith.constant 0 : index
    %54 = vector.load %arg4[%c0_59, %c0_60, %c0_61] : memref<5x128x256xf32, #tpu.memory_space<vmem>>, vector<1x128x256xf32>
    %55 = vector.shape_cast %54 : vector<1x128x256xf32> to vector<128x256xf32>
    %cst_62 = arith.constant dense<0.000000e+00> : vector<48x256xf32>
    %56 = tpu.matmul %53, %55, %cst_62 {dimension_numbers = #tpu.dot_dimension_numbers<[1], [0], [0], [1], [0, 0, 1, 1], [], []>} : vector<48x128xf32>, vector<128x256xf32>, vector<48x256xf32> -> vector<48x256xf32>
    %c0_63 = arith.constant 0 : index
    %c0_64 = arith.constant 0 : index
    %57 = vector.load %arg13[%c0_63, %c0_64] : memref<48x256xf32, #tpu.memory_space<vmem>>, vector<48x256xf32>
    tpu.vector_store %arg13[%c0_63, %c0_64], %56 {strides = array<i32>} : memref<48x256xf32, #tpu.memory_space<vmem>>, vector<48x256xf32>,
    %c0_65 = arith.constant 0 : index
    %c0_66 = arith.constant 0 : index
    %58 = vector.load %arg13[%c0_65, %c0_66] : memref<48x256xf32, #tpu.memory_space<vmem>>, vector<48x256xf32>
    %c0_67 = arith.constant 0 : index
    %c2_68 = arith.constant 2 : index
    %c0_69 = arith.constant 0 : index
    %59 = vector.load %arg12[%c0_67, %c2_68, %c0_69] : memref<2x40x128xf32, #tpu.memory_space<vmem>>, vector<2x24x128xf32>
    %60 = vector.shape_cast %59 : vector<2x24x128xf32> to vector<48x128xf32>
    %c1_70 = arith.constant 1 : index
    %c0_71 = arith.constant 0 : index
    %c0_72 = arith.constant 0 : index
    %61 = vector.load %arg4[%c1_70, %c0_71, %c0_72] : memref<5x128x256xf32, #tpu.memory_space<vmem>>, vector<1x128x256xf32>
    %62 = vector.shape_cast %61 : vector<1x128x256xf32> to vector<128x256xf32>
    %cst_73 = arith.constant dense<0.000000e+00> : vector<48x256xf32>
    %63 = tpu.matmul %60, %62, %cst_73 {dimension_numbers = #tpu.dot_dimension_numbers<[1], [0], [0], [1], [0, 0, 1, 1], [], []>} : vector<48x128xf32>, vector<128x256xf32>, vector<48x256xf32> -> vector<48x256xf32>
    %64 = arith.addf %58, %63 : vector<48x256xf32>
    %c0_74 = arith.constant 0 : index
    %c0_75 = arith.constant 0 : index
    %65 = vector.load %arg13[%c0_74, %c0_75] : memref<48x256xf32, #tpu.memory_space<vmem>>, vector<48x256xf32>
    tpu.vector_store %arg13[%c0_74, %c0_75], %64 {strides = array<i32>} : memref<48x256xf32, #tpu.memory_space<vmem>>, vector<48x256xf32>,
    %c0_76 = arith.constant 0 : index
    %c0_77 = arith.constant 0 : index
    %66 = vector.load %arg13[%c0_76, %c0_77] : memref<48x256xf32, #tpu.memory_space<vmem>>, vector<48x256xf32>
    %c0_78 = arith.constant 0 : index
    %c4_79 = arith.constant 4 : index
    %c0_80 = arith.constant 0 : index
    %67 = vector.load %arg12[%c0_78, %c4_79, %c0_80] : memref<2x40x128xf32, #tpu.memory_space<vmem>>, vector<2x24x128xf32>
    %68 = vector.shape_cast %67 : vector<2x24x128xf32> to vector<48x128xf32>
    %c2_81 = arith.constant 2 : index
    %c0_82 = arith.constant 0 : index
    %c0_83 = arith.constant 0 : index
    %69 = vector.load %arg4[%c2_81, %c0_82, %c0_83] : memref<5x128x256xf32, #tpu.memory_space<vmem>>, vector<1x128x256xf32>
    %70 = vector.shape_cast %69 : vector<1x128x256xf32> to vector<128x256xf32>
    %cst_84 = arith.constant dense<0.000000e+00> : vector<48x256xf32>
    %71 = tpu.matmul %68, %70, %cst_84 {dimension_numbers = #tpu.dot_dimension_numbers<[1], [0], [0], [1], [0, 0, 1, 1], [], []>} : vector<48x128xf32>, vector<128x256xf32>, vector<48x256xf32> -> vector<48x256xf32>
    %72 = arith.addf %66, %71 : vector<48x256xf32>
    %c0_85 = arith.constant 0 : index
    %c0_86 = arith.constant 0 : index
    %73 = vector.load %arg13[%c0_85, %c0_86] : memref<48x256xf32, #tpu.memory_space<vmem>>, vector<48x256xf32>
    tpu.vector_store %arg13[%c0_85, %c0_86], %72 {strides = array<i32>} : memref<48x256xf32, #tpu.memory_space<vmem>>, vector<48x256xf32>,
    %c0_87 = arith.constant 0 : index
    %c0_88 = arith.constant 0 : index
    %74 = vector.load %arg13[%c0_87, %c0_88] : memref<48x256xf32, #tpu.memory_space<vmem>>, vector<48x256xf32>
    %c0_89 = arith.constant 0 : index
    %c6 = arith.constant 6 : index
    %c0_90 = arith.constant 0 : index
    %75 = vector.load %arg12[%c0_89, %c6, %c0_90] : memref<2x40x128xf32, #tpu.memory_space<vmem>>, vector<2x24x128xf32>
    %76 = vector.shape_cast %75 : vector<2x24x128xf32> to vector<48x128xf32>
    %c3_91 = arith.constant 3 : index
    %c0_92 = arith.constant 0 : index
    %c0_93 = arith.constant 0 : index
    %77 = vector.load %arg4[%c3_91, %c0_92, %c0_93] : memref<5x128x256xf32, #tpu.memory_space<vmem>>, vector<1x128x256xf32>
    %78 = vector.shape_cast %77 : vector<1x128x256xf32> to vector<128x256xf32>
    %cst_94 = arith.constant dense<0.000000e+00> : vector<48x256xf32>
    %79 = tpu.matmul %76, %78, %cst_94 {dimension_numbers = #tpu.dot_dimension_numbers<[1], [0], [0], [1], [0, 0, 1, 1], [], []>} : vector<48x128xf32>, vector<128x256xf32>, vector<48x256xf32> -> vector<48x256xf32>
    %80 = arith.addf %74, %79 : vector<48x256xf32>
    %c0_95 = arith.constant 0 : index
    %c0_96 = arith.constant 0 : index
    %81 = vector.load %arg13[%c0_95, %c0_96] : memref<48x256xf32, #tpu.memory_space<vmem>>, vector<48x256xf32>
    tpu.vector_store %arg13[%c0_95, %c0_96], %80 {strides = array<i32>} : memref<48x256xf32, #tpu.memory_space<vmem>>, vector<48x256xf32>,
    %c0_97 = arith.constant 0 : index
    %c0_98 = arith.constant 0 : index
    %82 = vector.load %arg13[%c0_97, %c0_98] : memref<48x256xf32, #tpu.memory_space<vmem>>, vector<48x256xf32>
    %c0_99 = arith.constant 0 : index
    %c8 = arith.constant 8 : index
    %c0_100 = arith.constant 0 : index
    %83 = vector.load %arg12[%c0_99, %c8, %c0_100] : memref<2x40x128xf32, #tpu.memory_space<vmem>>, vector<2x24x128xf32>
    %84 = vector.shape_cast %83 : vector<2x24x128xf32> to vector<48x128xf32>
    %c4_101 = arith.constant 4 : index
    %c0_102 = arith.constant 0 : index
    %c0_103 = arith.constant 0 : index
    %85 = vector.load %arg4[%c4_101, %c0_102, %c0_103] : memref<5x128x256xf32, #tpu.memory_space<vmem>>, vector<1x128x256xf32>
    %86 = vector.shape_cast %85 : vector<1x128x256xf32> to vector<128x256xf32>
    %cst_104 = arith.constant dense<0.000000e+00> : vector<48x256xf32>
    %87 = tpu.matmul %84, %86, %cst_104 {dimension_numbers = #tpu.dot_dimension_numbers<[1], [0], [0], [1], [0, 0, 1, 1], [], []>} : vector<48x128xf32>, vector<128x256xf32>, vector<48x256xf32> -> vector<48x256xf32>
    %88 = arith.addf %82, %87 : vector<48x256xf32>
    %c0_105 = arith.constant 0 : index
    %c0_106 = arith.constant 0 : index
    %89 = vector.load %arg13[%c0_105, %c0_106] : memref<48x256xf32, #tpu.memory_space<vmem>>, vector<48x256xf32>
    tpu.vector_store %arg13[%c0_105, %c0_106], %88 {strides = array<i32>} : memref<48x256xf32, #tpu.memory_space<vmem>>, vector<48x256xf32>,
    %c0_107 = arith.constant 0 : index
    %c0_108 = arith.constant 0 : index
    %90 = vector.load %arg13[%c0_107, %c0_108] : memref<48x256xf32, #tpu.memory_space<vmem>>, vector<48x128xf32>
    %c0_109 = arith.constant 0 : index
    %c128_110 = arith.constant 128 : index
    %91 = vector.load %arg13[%c0_109, %c128_110] : memref<48x256xf32, #tpu.memory_space<vmem>>, vector<48x128xf32>
    %92 = arith.maximumf %90, %91 : vector<48x128xf32>
    %93 = vector.shape_cast %92 : vector<48x128xf32> to vector<2x24x128xf32>
    %c0_111 = arith.constant 0 : index
    %c0_112 = arith.constant 0 : index
    %c0_113 = arith.constant 0 : index
    %94 = vector.load %arg14[%c0_111, %c0_112, %c0_113] : memref<2x24x128xf32, #tpu.memory_space<vmem>>, vector<2x24x128xf32>
    tpu.vector_store %arg14[%c0_111, %c0_112, %c0_113], %93 {strides = array<i32>} : memref<2x24x128xf32, #tpu.memory_space<vmem>>, vector<2x24x128xf32>,
    %c0_114 = arith.constant 0 : index
    %c0_115 = arith.constant 0 : index
    %c0_116 = arith.constant 0 : index
    %95 = vector.load %arg14[%c0_114, %c0_115, %c0_116] : memref<2x24x128xf32, #tpu.memory_space<vmem>>, vector<2x16x128xf32>
    %c0_117 = arith.constant 0 : index
    %c2_118 = arith.constant 2 : index
    %c0_119 = arith.constant 0 : index
    %96 = vector.load %arg14[%c0_117, %c2_118, %c0_119] : memref<2x24x128xf32, #tpu.memory_space<vmem>>, vector<2x16x128xf32>
    %97 = arith.maximumf %95, %96 : vector<2x16x128xf32>
    %c0_120 = arith.constant 0 : index
    %c0_121 = arith.constant 0 : index
    %98 = vector.load %arg5[%c0_120, %c0_121] : memref<1x128xf32, #tpu.memory_space<vmem>>, vector<1x128xf32>
    %99 = vector.shape_cast %98 : vector<1x128xf32> to vector<1x1x128xf32>
    %100 = vector.broadcast %99 : vector<1x1x128xf32> to vector<2x16x128xf32>
    %101 = arith.addf %97, %100 : vector<2x16x128xf32>
    %cst_122 = arith.constant 0.000000e+00 : f32
    %102 = vector.broadcast %cst_122 : f32 to vector<2x16x128xf32>
    %103 = arith.maximumf %101, %102 : vector<2x16x128xf32>
    %104 = vector.shape_cast %103 : vector<2x16x128xf32> to vector<32x128xf32>
    %c0_123 = arith.constant 0 : index
    %c0_124 = arith.constant 0 : index
    %105 = vector.load %arg6[%c0_123, %c0_124] : memref<128x40xf32, #tpu.memory_space<vmem>>, vector<128x40xf32>
    %cst_125 = arith.constant dense<0.000000e+00> : vector<32x40xf32>
    %106 = tpu.matmul %104, %105, %cst_125 {dimension_numbers = #tpu.dot_dimension_numbers<[1], [0], [0], [1], [0, 0, 1, 1], [], []>} : vector<32x128xf32>, vector<128x40xf32>, vector<32x40xf32> -> vector<32x40xf32>
    %107 = vector.shape_cast %106 : vector<32x40xf32> to vector<2x16x40xf32>
    %c0_126 = arith.constant 0 : index
    %c0_127 = arith.constant 0 : index
    %108 = vector.load %arg7[%c0_126, %c0_127] : memref<16x40xf32, #tpu.memory_space<vmem>>, vector<16x40xf32>
    %109 = vector.shape_cast %108 : vector<16x40xf32> to vector<1x16x40xf32>
    %110 = vector.broadcast %109 : vector<1x16x40xf32> to vector<2x16x40xf32>
    %111 = arith.mulf %107, %110 : vector<2x16x40xf32>
    %cst_128 = arith.constant dense<0.000000e+00> : vector<2x40xf32>
    %112 = vector.multi_reduction <add>, %111, %cst_128 [1] : vector<2x16x40xf32> to vector<2x40xf32>
    %c0_129 = arith.constant 0 : index
    %c0_130 = arith.constant 0 : index
    %113 = vector.load %arg8[%c0_129, %c0_130] : memref<40x10xf32, #tpu.memory_space<vmem>>, vector<40x10xf32>
    %cst_131 = arith.constant dense<0.000000e+00> : vector<2x10xf32>
    %114 = tpu.matmul %112, %113, %cst_131 {dimension_numbers = #tpu.dot_dimension_numbers<[1], [0], [0], [1], [0, 0, 1, 1], [], []>} : vector<2x40xf32>, vector<40x10xf32>, vector<2x10xf32> -> vector<2x10xf32>
    %c0_132 = arith.constant 0 : index
    %c0_133 = arith.constant 0 : index
    %115 = vector.load %arg9[%c0_132, %c0_133] : memref<1x10xf32, #tpu.memory_space<vmem>>, vector<1x10xf32>
    %116 = vector.broadcast %115 : vector<1x10xf32> to vector<2x10xf32>
    %117 = arith.addf %114, %116 : vector<2x10xf32>
    %c0_134 = arith.constant 0 : index
    %c0_135 = arith.constant 0 : index
    %118 = vector.load %arg10[%c0_134, %c0_135] : memref<2x10xf32, #tpu.memory_space<vmem>>, vector<2x10xf32>
    tpu.vector_store %arg10[%c0_134, %c0_135], %117 {strides = array<i32>} : memref<2x10xf32, #tpu.memory_space<vmem>>, vector<2x10xf32>,
    return
  }
  func.func @transform_0(%arg0: i32) -> (i32, i32, i32) {
    %c0_i32 = arith.constant 0 : i32
    %c0_i32_0 = arith.constant 0 : i32
    %c0_i32_1 = arith.constant 0 : i32
    return %arg0, %c0_i32, %c0_i32_0 : i32, i32, i32
  }
  func.func @transform_1(%arg0: i32) -> (i32, i32, i32) {
    %c0_i32 = arith.constant 0 : i32
    %c0_i32_0 = arith.constant 0 : i32
    %c0_i32_1 = arith.constant 0 : i32
    %c0_i32_2 = arith.constant 0 : i32
    return %c0_i32, %c0_i32_0, %c0_i32_1 : i32, i32, i32
  }
  func.func @transform_2(%arg0: i32) -> (i32, i32) {
    %c0_i32 = arith.constant 0 : i32
    %c0_i32_0 = arith.constant 0 : i32
    %c0_i32_1 = arith.constant 0 : i32
    return %c0_i32, %c0_i32_0 : i32, i32
  }
  func.func @transform_3(%arg0: i32) -> (i32, i32, i32) {
    %c0_i32 = arith.constant 0 : i32
    %c0_i32_0 = arith.constant 0 : i32
    %c0_i32_1 = arith.constant 0 : i32
    %c0_i32_2 = arith.constant 0 : i32
    return %c0_i32, %c0_i32_0, %c0_i32_1 : i32, i32, i32
  }
  func.func @transform_4(%arg0: i32) -> (i32, i32) {
    %c0_i32 = arith.constant 0 : i32
    %c0_i32_0 = arith.constant 0 : i32
    %c0_i32_1 = arith.constant 0 : i32
    return %c0_i32, %c0_i32_0 : i32, i32
  }
  func.func @transform_5(%arg0: i32) -> (i32, i32) {
    %c0_i32 = arith.constant 0 : i32
    %c0_i32_0 = arith.constant 0 : i32
    %c0_i32_1 = arith.constant 0 : i32
    return %c0_i32, %c0_i32_0 : i32, i32
  }
  func.func @transform_6(%arg0: i32) -> (i32, i32) {
    %c0_i32 = arith.constant 0 : i32
    %c0_i32_0 = arith.constant 0 : i32
    %c0_i32_1 = arith.constant 0 : i32
    return %c0_i32, %c0_i32_0 : i32, i32
  }
  func.func @transform_7(%arg0: i32) -> (i32, i32) {
    %c0_i32 = arith.constant 0 : i32
    %c0_i32_0 = arith.constant 0 : i32
    %c0_i32_1 = arith.constant 0 : i32
    return %c0_i32, %c0_i32_0 : i32, i32
  }
  func.func @transform_8(%arg0: i32) -> (i32, i32) {
    %c0_i32 = arith.constant 0 : i32
    %c0_i32_0 = arith.constant 0 : i32
    %c0_i32_1 = arith.constant 0 : i32
    return %c0_i32, %c0_i32_0 : i32, i32
  }
  func.func @transform_9(%arg0: i32) -> (i32, i32) {
    %c0_i32 = arith.constant 0 : i32
    %c0_i32_0 = arith.constant 0 : i32
    return %arg0, %c0_i32 : i32, i32
  }
}

</mosaic_0001>

<bundles_post_ra>
// kernel: tpu_custom_call.1
= control target key start
LH: loop header
LB: loop body
LE: loop exit
PB: predicated region body
PF: predicated region fallthrough
CT: control target
= control target key end

     0   :  { %14 = vsyncpa [#allocation7], 0  ;;  %s3709_s0 = inlined_call_operand.vmem [shape: f32[2,48,28], index: 0, kind: input, shape index: {}]   ;;  %s3710_s1 = inlined_call_operand.vmem [shape: f32[5,28,256], index: 1, kind: input, shape index: {}]   ;;  %s3711_s2 = inlined_call_operand.vmem [shape: f32[1,128], index: 2, kind: input, shape index: {}]   ;;  %s3712_s3 = inlined_call_operand.hbm [shape: f32[5,128,256], index: 3, kind: input, shape index: {}]   ;;  %s3713_s4 = inlined_call_operand.vmem [shape: f32[1,128], index: 4, kind: input, shape index: {}]   ;;  %s3714_s5 = inlined_call_operand.vmem [shape: f32[128,40], index: 5, kind: input, shape index: {}]   ;;  %s3715_s6 = inlined_call_operand.vmem [shape: f32[16,40], index: 6, kind: input, shape index: {}]   ;;  %s3716_s7 = inlined_call_operand.vmem [shape: f32[40,10], index: 7, kind: input, shape index: {}]   ;;  %s3717_s8 = inlined_call_operand.vmem [shape: f32[1,10], index: 8, kind: input, shape index: {}]   ;;  %s3718_s9 = inlined_call_operand.hbm [shape: f32[2,10], index: 9, kind: output, shape index: {}]  }
   0x1   :  { %15 = vsyncpa [#allocation8], 0  ;;  %s3066_s30 = smov [#allocation6]   ;;  %s3018_s13 = scalar_lea.hbm %s3712_s3, 20480 }
   0x2   :  { %s27_s10 = sshll.u32 %s3066_s30, 4  ;;  %p3019_p0 = scmp.ne.s32.totalorder %s3712_s3, %s3018_s13  ;;  %s28_s10 = int_to_ptr.vmem [resolvable:$true] %s27_s10 }
   0x3   :  { %p3022_p1 = scmp.lt.u32.totalorder %s3018_s13, %s3712_s3 }
   0x5   :  { %p3024_p2 = pnand %p3022_p1, %p3019_p0 }
   0x7   :  { %3027 = shalt.err (!%p3024_p2)
}
   0x8   :  { %s3028_s18 = scalar_lea.vmem %s28_s10, 20480  ;;  %p3033_p4 = scmp.lt.s32.totalorder %s28_s10, %s28_s10 }
   0x9   :  { %p3029_p3 = scmp.ne.s32.totalorder %s28_s10, %s3028_s18  ;;  %p3034_p5 = scmp.lt.s32.totalorder %s3028_s18, %s3028_s18 }
   0xb   :  { %p3035_p6 = por %p3034_p5, %p3033_p4 }
   0xd   :  { %p3036_p7 = pnand %p3035_p6, %p3029_p3 }
   0xf   :  { %3039 = shalt.err (!%p3036_p7)
}
  0x10   :  { %s3067_s19 = smov 256   ;;  %s3068_s20 = smov 16  }
  0x11   :  { %33 = dma.hbm_to_vmem [thread:$0]  %s3712_s3, 20480, %s28_s10, [#allocation7], %s3067_s19, %s3067_s19, %s3068_s20  }
  0x12   :  { %3062 = dma.done.wait [#allocation7], 20480  }
  0x13   :  { %3063 = vsyncadd [#allocation7], 4294946816  ;;  %v3069_v0 = vmov 0.0   ;;  %vm96_vm0 = vcmask 1043456   ;;  %v58_v1 = vld [vmem:[%s3710_s1 + $0x8] sm:$0xff]  ;;  %v60_v2 = vld [vmem:[%s3710_s1 + $0x18] sm:$0xff] }
  0x14   :  { %167 = vmatprep.mubr.f32.mxu0 %v3069_v0  ;;  %1426 = vmatprep.mubr.f32.mxu1 %v3069_v0  ;;  %v57_v3 = vld [vmem:[%s3710_s1] sm:$0xff]  ;;  %v2634_v4 = vpack.c.bf16 %v60_v2, %v58_v1  ;;  %v59_v5 = vld [vmem:[%s3710_s1 + $0x10] sm:$0xff]  ;;  %v62_v6 = vld [vmem:[%s3710_s1 + $0x28] sm:$0xff]  ;;  %vm3070_vm1 = vmmov 1   ;;  %vm65_vm3 = vcmask 228352   ;;  %vm1248_vm4 = vcmask 1046528  }
  0x15   :  { %v64_v7 = vld [vmem:[%s3710_s1 + $0x38] sm:$0xf]  ;;  %v2636_v8 = vpack.c.bf16 %v59_v5, %v57_v3  ;;  %vm3156_vm2 = vmpackc.low %vm96_vm0, %vm3070_vm1  ;;  %v61_v11 = vld [vmem:[%s3710_s1 + $0x20] sm:$0xff]  ;;  %vm3072_vm5 = vmmov 0   ;;  %vm2337_vm6 = vcmask 326656   ;;  %vm2370_vm7 = vcmask 1041409  }
  0x16   :  { %v2638_v9 = vpack.c.bf16 %v64_v7, %v62_v6  ;;  %v63_v12 = vld [vmem:[%s3710_s1 + $0x30] sm:$0xf]  ;;  %2635 = vmatprep.subr.bf16.mxu0 %v2634_v4  ;;  %v2474_v13 = vld [vmem:[%s3710_s1 + $0x48] sm:$0xff]  ;;  %v2476_v14 = vld [vmem:[%s3710_s1 + $0x58] sm:$0xff]  ;;  %s3073_s23 = smov [#allocation9]   ;;  %vm2444_vm8 = vcmask 74752  }
  0x17   :  { %2637 = vmatpush1.bf16.msra.mxu0 %v2636_v8  ;;  %v2641_v15 = vpack.c.bf16 %v63_v12, %v61_v11  ;;  %v2644_v16 = vpack.c.bf16 %v2476_v14, %v2474_v13  ;;  %v2473_v17 = vld [vmem:[%s3710_s1 + $0x40] sm:$0xff]  ;;  %v2475_v18 = vld [vmem:[%s3710_s1 + $0x50] sm:$0xff]  ;;  %v2478_v19 = vld [vmem:[%s3710_s1 + $0x68] sm:$0xff]  ;;  %s2452_s24 = sshll.u32 %s3073_s23, 4  ;;  %s2453_s24 = int_to_ptr.vmem [resolvable:$true] %s2452_s24 }
  0x18   :  { %2640 = vmatprep.subr.msk.bf16.mxu0 %vm3156_vm2, %v2638_v9  ;;  %v2480_v20 = vld [vmem:[%s3710_s1 + $0x78] sm:$0xf]  ;;  %v47_v21 = vld [vmem:[%s3709_s0] sm:$0xff]  ;;  %v2646_v22 = vpack.c.bf16 %v2475_v18, %v2473_v17  ;;  %v2479_v25 = vld [vmem:[%s3710_s1 + $0x70] sm:$0xf]  ;;  %p3045_p9 = scmp.lt.s32.totalorder %s2453_s24, %s2453_s24 }
  0x19   :  { %v2648_v23 = vpack.c.bf16 %v2480_v20, %v2478_v19  ;;  %v2477_v24 = vld [vmem:[%s3710_s1 + $0x60] sm:$0xff]  ;;  %v2494_v26 = vld [vmem:[%s3710_s1 + $0x88] sm:$0xff]  ;;  %v2496_v27 = vld [vmem:[%s3710_s1 + $0x98] sm:$0xff] }
  0x1a   :  { %v48_v28 = vld [vmem:[%s3709_s0 + $0x8] sm:$0xff]  ;;  %v2651_v29 = vpack.c.bf16 %v2479_v25, %v2477_v24  ;;  %v2654_v30 = vpack.c.bf16 %v2496_v27, %v2494_v26  ;;  %v49_v31 = vld [vmem:[%s3709_s0 + $0x10] sm:$0xff]  ;;  %v50_v32 = vld [vmem:[%s3709_s0 + $0x18] sm:$0xff] }
  0x1b   :  { %2643 = vmatpush1.bf16.msk.msra.mxu0 %vm3156_vm2, %v2641_v15  ;;  %v51_v33 = vld [vmem:[%s3709_s0 + $0x20] sm:$0xff]  ;;  %v52_v34 = vld [vmem:[%s3709_s0 + $0x30] sm:$0xff]  ;;  %v53_v35 = vld [vmem:[%s3709_s0 + $0x38] sm:$0xff] }
  0x1c   :  { %2645 = vmatprep.subr.bf16.mxu0 %v2644_v16  ;;  %v54_v36 = vld [vmem:[%s3709_s0 + $0x40] sm:$0xff]  ;;  %v55_v37 = vld [vmem:[%s3709_s0 + $0x48] sm:$0xff]  ;;  %v56_v38 = vld [vmem:[%s3709_s0 + $0x50] sm:$0xff] }
  0x1d   :  { %v2493_v39 = vld [vmem:[%s3710_s1 + $0x80] sm:$0xff]  ;;  %v2495_v40 = vld [vmem:[%s3710_s1 + $0x90] sm:$0xff]  ;;  %v2498_v41 = vld [vmem:[%s3710_s1 + $0xa8] sm:$0xff] }
  0x1e   :  { %2463 = vmatmul.mubr.msk.f32.vlgmr.msra.gmra.mrb[0].mxu0 %vm65_vm3, %v47_v21  ;;  %v2500_v42 = vld [vmem:[%s3710_s1 + $0xb8] sm:$0xf]  ;;  %v268_v43 = vld [vmem:[%s3709_s0 + $0x1] sm:$0xff]  ;;  %v2656_v44 = vpack.c.bf16 %v2495_v40, %v2493_v39  ;;  %v2499_v47 = vld [vmem:[%s3710_s1 + $0xb0] sm:$0xf] }
  0x1f   :  { %2647 = vmatpush1.bf16.msra.mxu0 %v2646_v22  ;;  %173 = vmatprep.mubr.f32.mxu0 %v3069_v0  ;;  %v2658_v45 = vpack.c.bf16 %v2500_v42, %v2498_v41  ;;  %v2497_v46 = vld [vmem:[%s3710_s1 + $0xa0] sm:$0xff]  ;;  %v2514_v48 = vld [vmem:[%s3710_s1 + $0xc8] sm:$0xff]  ;;  %v2516_v49 = vld [vmem:[%s3710_s1 + $0xd8] sm:$0xff] }
  0x20   :  { %2650 = vmatprep.subr.msk.bf16.mxu0 %vm3156_vm2, %v2648_v23  ;;  %v269_v50 = vld [vmem:[%s3709_s0 + $0x9] sm:$0xff]  ;;  %v2661_v51 = vpack.c.bf16 %v2499_v47, %v2497_v46  ;;  %v2664_v52 = vpack.c.bf16 %v2516_v49, %v2514_v48  ;;  %v270_v53 = vld [vmem:[%s3709_s0 + $0x11] sm:$0xff]  ;;  %v271_v54 = vld [vmem:[%s3709_s0 + $0x19] sm:$0xff] }
  0x21   :  { %v272_v55 = vld [vmem:[%s3709_s0 + $0x21] sm:$0xff]  ;;  %v273_v56 = vld [vmem:[%s3709_s0 + $0x31] sm:$0xff]  ;;  %v274_v57 = vld [vmem:[%s3709_s0 + $0x39] sm:$0xff] }
  0x22   :  { %2464 = vmatmul.mubr.msk.f32.gmra.mrb[2].mxu0 %vm65_vm3, %v48_v28  ;;  %v275_v58 = vld [vmem:[%s3709_s0 + $0x41] sm:$0xff]  ;;  %v276_v59 = vld [vmem:[%s3709_s0 + $0x49] sm:$0xff]  ;;  %v1333_v61 = vld [vmem:[#allocation6 + $0x18] sm:$0xff] }
  0x23   :  { %179 = vmatprep.mubr.f32.mxu0 %v3069_v0  ;;  %2653 = vmatpush1.bf16.msk.msra.mxu0 %vm3156_vm2, %v2651_v29  ;;  %v1331_v60 = vld [vmem:[#allocation6 + $0x8] sm:$0xff]  ;;  %v1330_v62 = vld [vmem:[#allocation6] sm:$0xff]  ;;  %v1332_v1 = vld [vmem:[#allocation6 + $0x10] sm:$0xff] }
  0x24   :  { %2655 = vmatprep.subr.bf16.mxu0 %v2654_v30  ;;  %v2684_v63 = vpack.c.bf16 %v1333_v61, %v1331_v60  ;;  %v1335_v2 = vld [vmem:[#allocation6 + $0x28] sm:$0xff]  ;;  %v1337_v3 = vld [vmem:[#allocation6 + $0x38] sm:$0xff]  ;;  %v2686_v4 = vpack.c.bf16 %v1332_v1, %v1330_v62  ;;  %v1334_v6 = vld [vmem:[#allocation6 + $0x20] sm:$0xff] }
  0x25   :  { %v2688_v5 = vpack.c.bf16 %v1337_v3, %v1335_v2  ;;  %v1336_v7 = vld [vmem:[#allocation6 + $0x30] sm:$0xff]  ;;  %v2513_v11 = vld [vmem:[%s3710_s1 + $0xc0] sm:$0xff]  ;;  %v2518_v13 = vld [vmem:[%s3710_s1 + $0xe8] sm:$0xff] }
  0x26   :  { %2465 = vmatmul.mubr.msk.f32.gmra.mrb[4].mxu0 %vm65_vm3, %v49_v31  ;;  %2685 = vmatprep.subr.bf16.mxu1 %v2684_v63  ;;  %v2690_v8 = vpack.c.bf16 %v1336_v7, %v1334_v6  ;;  %v277_v9 = vld [vmem:[%s3709_s0 + $0x51] sm:$0xff]  ;;  %v508_v15 = vld [vmem:[%s3709_s0 + $0x2] sm:$0xff]  ;;  %v511_v26 = vld [vmem:[%s3709_s0 + $0x1a] sm:$0xff] }
  0x27   :  { %185 = vmatprep.mubr.f32.mxu0 %v3069_v0  ;;  %2687 = vmatpush1.bf16.msra.mxu1 %v2686_v4  ;;  %v2515_v12 = vld [vmem:[%s3710_s1 + $0xd0] sm:$0xff]  ;;  %v2520_v14 = vld [vmem:[%s3710_s1 + $0xf8] sm:$0xf]  ;;  %v2517_v18 = vld [vmem:[%s3710_s1 + $0xe0] sm:$0xff] }
  0x28   :  { %2689 = vmatprep.subr.bf16.mxu1 %v2688_v5  ;;  %v2666_v16 = vpack.c.bf16 %v2515_v12, %v2513_v11  ;;  %v2668_v17 = vpack.c.bf16 %v2520_v14, %v2518_v13  ;;  %v2519_v19 = vld [vmem:[%s3710_s1 + $0xf0] sm:$0xf]  ;;  %v2534_v20 = vld [vmem:[%s3710_s1 + $0x108] sm:$0xff]  ;;  %v2536_v21 = vld [vmem:[%s3710_s1 + $0x118] sm:$0xff] }
  0x29   :  { %v509_v22 = vld [vmem:[%s3709_s0 + $0xa] sm:$0xff]  ;;  %v2671_v23 = vpack.c.bf16 %v2519_v19, %v2517_v18  ;;  %v2674_v24 = vpack.c.bf16 %v2536_v21, %v2534_v20  ;;  %v510_v25 = vld [vmem:[%s3709_s0 + $0x12] sm:$0xff]  ;;  %v512_v27 = vld [vmem:[%s3709_s0 + $0x22] sm:$0xff] }
  0x2a   :  { %2466 = vmatmul.mubr.msk.f32.gmra.mrb[6].mxu0 %vm65_vm3, %v50_v32  ;;  %v513_v28 = vld [vmem:[%s3709_s0 + $0x32] sm:$0xff]  ;;  %v514_v29 = vld [vmem:[%s3709_s0 + $0x3a] sm:$0xff]  ;;  %v515_v30 = vld [vmem:[%s3709_s0 + $0x42] sm:$0xff] }
  0x2b   :  { %191 = vmatprep.mubr.f32.mxu0 %v3069_v0  ;;  %2691 = vmatpush1.bf16.msra.mxu1 %v2690_v8  ;;  %v516_v31 = vld [vmem:[%s3709_s0 + $0x4a] sm:$0xff]  ;;  %v517_v32 = vld [vmem:[%s3709_s0 + $0x52] sm:$0xff]  ;;  %v2537_v40 = vld [vmem:[%s3710_s1 + $0x120] sm:$0xff] }
  0x2c   :  { %v2539_v41 = vld [vmem:[%s3710_s1 + $0x130] sm:$0xf]  ;;  %v752_v46 = vld [vmem:[%s3709_s0 + $0x23] sm:$0xff]  ;;  %v754_v47 = vld [vmem:[%s3709_s0 + $0x3b] sm:$0xff] }
  0x2d   :  { %v749_v42 = vld [vmem:[%s3709_s0 + $0xb] sm:$0xff]  ;;  %v753_v10 = vld [vmem:[%s3709_s0 + $0x33] sm:$0xff]  ;;  %v755_v48 = vld [vmem:[%s3709_s0 + $0x43] sm:$0xff] }
  0x2e   :  { %2467 = vmatmul.mubr.msk.f32.gmra.mrb[8].mxu0 %vm65_vm3, %v51_v33  ;;  %v2533_v33 = vld [vmem:[%s3710_s1 + $0x100] sm:$0xff]  ;;  %v756_v49 = vld [vmem:[%s3709_s0 + $0x4b] sm:$0xff]  ;;  %v997_v60 = vld [vmem:[%s3709_s0 + $0x54] sm:$0xff] }
  0x2f   :  { %197 = vmatprep.mubr.f32.mxu0 %v3069_v0  ;;  %v1339_v61 = vld [vmem:[#allocation6 + $0x48] sm:$0xff]  ;;  %v1341_v62 = vld [vmem:[#allocation6 + $0x58] sm:$0xff]  ;;  %v1338_v1 = vld [vmem:[#allocation6 + $0x40] sm:$0xff] }
  0x30   :  { %v2692_v63 = vpack.c.bf16 %v1341_v62, %v1339_v61  ;;  %v1340_v2 = vld [vmem:[#allocation6 + $0x50] sm:$0xff]  ;;  %v1343_v4 = vld [vmem:[#allocation6 + $0x68] sm:$0xff]  ;;  %v1345_v5 = vld [vmem:[#allocation6 + $0x78] sm:$0xff] }
  0x31   :  { %v2694_v3 = vpack.c.bf16 %v1340_v2, %v1338_v1  ;;  %v2696_v6 = vpack.c.bf16 %v1345_v5, %v1343_v4  ;;  %v1342_v7 = vld [vmem:[#allocation6 + $0x60] sm:$0xff]  ;;  %v1344_v8 = vld [vmem:[#allocation6 + $0x70] sm:$0xff]  ;;  %v1347_v11 = vld [vmem:[#allocation6 + $0x88] sm:$0xff] }
  0x32   :  { %2468 = vmatmul.mubr.msk.f32.gmra.mrb[10].mxu0 %vm65_vm3, %v52_v34  ;;  %v2535_v34 = vld [vmem:[%s3710_s1 + $0x110] sm:$0xff]  ;;  %2693 = vmatprep.subr.bf16.mxu1 %v2692_v63  ;;  %v1349_v12 = vld [vmem:[#allocation6 + $0x98] sm:$0xff]  ;;  %v1346_v14 = vld [vmem:[#allocation6 + $0x80] sm:$0xff] }
  0x33   :  { %203 = vmatprep.mubr.f32.mxu0 %v3069_v0  ;;  %2695 = vmatpush1.bf16.msra.mxu1 %v2694_v3  ;;  %v2700_v13 = vpack.c.bf16 %v1349_v12, %v1347_v11  ;;  %v1353_v18 = vld [vmem:[#allocation6 + $0xb8] sm:$0xff]  ;;  %v1350_v20 = vld [vmem:[#allocation6 + $0xa0] sm:$0xff]  ;;  %v1352_v21 = vld [vmem:[#allocation6 + $0xb0] sm:$0xff] }
  0x34   :  { %2697 = vmatprep.subr.bf16.mxu1 %v2696_v6  ;;  %v1498_v2 = vld [vmem:[#allocation6 + $0x120] sm:$0xff]  ;;  %v1500_v3 = vld [vmem:[#allocation6 + $0x130] sm:$0xff]  ;;  %v1503_v6 = vld [vmem:[#allocation6 + $0x148] sm:$0xff] }
  0x36   :  { %2469 = vmatmul.mubr.msk.f32.gmra.mrb[12].mxu0 %vm65_vm3, %v53_v35  ;;  %v2538_v35 = vld [vmem:[%s3710_s1 + $0x128] sm:$0xff] }
  0x37   :  { %209 = vmatprep.mubr.f32.mxu0 %v3069_v0 }
  0x3a   :  { %2470 = vmatmul.mubr.msk.f32.gmra.mrb[14].mxu0 %vm65_vm3, %v54_v36  ;;  %v2540_v36 = vld [vmem:[%s3710_s1 + $0x138] sm:$0xf] }
  0x3b   :  { %215 = vmatprep.mubr.f32.mxu0 %v3069_v0  ;;  %v2678_v39 = vpack.c.bf16 %v2540_v36, %v2538_v35  ;;  %v1495_v35 = vld [vmem:[#allocation6 + $0x108] sm:$0xff]  ;;  %v1497_v36 = vld [vmem:[#allocation6 + $0x118] sm:$0xff] }
  0x3e   :  { %2471 = vmatmul.mubr.msk.f32.gmra.mrb[16].mxu0 %vm65_vm3, %v55_v37  ;;  %v748_v37 = vld [vmem:[%s3709_s0 + $0x3] sm:$0xff] }
  0x3f   :  { %221 = vmatprep.mubr.f32.mxu0 %v3069_v0 }
  0x42   :  { %2472 = vmatmul.mubr.msk.f32.gmra.mrb[18].mxu0 %vm65_vm3, %v56_v38  ;;  %v2676_v38 = vpack.c.bf16 %v2535_v34, %v2533_v33  ;;  %v1360_v33 = vld [vmem:[#allocation6 + $0xf0] sm:$0xff] }
  0x43   :  { %387 = vmatprep.mubr.f32.mxu0 %v3069_v0 }
  0x46   :  { %2483 = vmatmul.mubr.msk.f32.vlgmr.msra.gmra.mrb[0].mxu0 %vm65_vm3, %v268_v43  ;;  %v2681_v43 = vpack.c.bf16 %v2539_v41, %v2537_v40 }
  0x47   :  { %2657 = vmatpush1.bf16.msra.mxu0 %v2656_v44  ;;  %393 = vmatprep.mubr.f32.mxu0 %v3069_v0  ;;  %v750_v44 = vld [vmem:[%s3709_s0 + $0x13] sm:$0xff] }
  0x48   :  { %2660 = vmatprep.subr.msk.bf16.mxu0 %vm3156_vm2, %v2658_v45  ;;  %v751_v45 = vld [vmem:[%s3709_s0 + $0x1b] sm:$0xff] }
  0x4a   :  { %2484 = vmatmul.mubr.msk.f32.gmra.mrb[2].mxu0 %vm65_vm3, %v269_v50  ;;  %v757_v50 = vld [vmem:[%s3709_s0 + $0x53] sm:$0xff] }
  0x4b   :  { %399 = vmatprep.mubr.f32.mxu0 %v3069_v0  ;;  %2663 = vmatpush1.bf16.msk.msra.mxu0 %vm3156_vm2, %v2661_v51  ;;  %v988_v51 = vld [vmem:[%s3709_s0 + $0x4] sm:$0xff] }
  0x4c   :  { %2665 = vmatprep.subr.bf16.mxu0 %v2664_v52  ;;  %v989_v52 = vld [vmem:[%s3709_s0 + $0xc] sm:$0xff] }
  0x4e   :  { %2485 = vmatmul.mubr.msk.f32.gmra.mrb[4].mxu0 %vm65_vm3, %v270_v53  ;;  %v990_v53 = vld [vmem:[%s3709_s0 + $0x14] sm:$0xff] }
  0x4f   :  { %405 = vmatprep.mubr.f32.mxu0 %v3069_v0 }
  0x52   :  { %2486 = vmatmul.mubr.msk.f32.gmra.mrb[6].mxu0 %vm65_vm3, %v271_v54  ;;  %v991_v54 = vld [vmem:[%s3709_s0 + $0x1c] sm:$0xff] }
  0x53   :  { %411 = vmatprep.mubr.f32.mxu0 %v3069_v0 }
  0x56   :  { %2487 = vmatmul.mubr.msk.f32.gmra.mrb[8].mxu0 %vm65_vm3, %v272_v55  ;;  %v992_v55 = vld [vmem:[%s3709_s0 + $0x24] sm:$0xff] }
  0x57   :  { %417 = vmatprep.mubr.f32.mxu0 %v3069_v0 }
  0x5a   :  { %2488 = vmatmul.mubr.msk.f32.gmra.mrb[10].mxu0 %vm65_vm3, %v273_v56  ;;  %v993_v56 = vld [vmem:[%s3709_s0 + $0x34] sm:$0xff] }
  0x5b   :  { %423 = vmatprep.mubr.f32.mxu0 %v3069_v0 }
  0x5e   :  { %2489 = vmatmul.mubr.msk.f32.gmra.mrb[12].mxu0 %vm65_vm3, %v274_v57  ;;  %v994_v57 = vld [vmem:[%s3709_s0 + $0x3c] sm:$0xff] }
  0x5f   :  { %429 = vmatprep.mubr.f32.mxu0 %v3069_v0 }
  0x62   :  { %2490 = vmatmul.mubr.msk.f32.gmra.mrb[14].mxu0 %vm65_vm3, %v275_v58  ;;  %v995_v58 = vld [vmem:[%s3709_s0 + $0x44] sm:$0xff] }
  0x63   :  { %435 = vmatprep.mubr.f32.mxu0 %v3069_v0 }
  0x66   :  { %2491 = vmatmul.mubr.msk.f32.gmra.mrb[16].mxu0 %vm65_vm3, %v276_v59  ;;  %v996_v59 = vld [vmem:[%s3709_s0 + $0x4c] sm:$0xff]  ;;  %s3040_s0 = scalar_lea.vmem %s2453_s24, 32 }
  0x67   :  { %441 = vmatprep.mubr.f32.mxu0 %v3069_v0  ;;  %p3041_p8 = scmp.ne.s32.totalorder %s2453_s24, %s3040_s0  ;;  %p3046_p10 = scmp.lt.s32.totalorder %s3040_s0, %s3040_s0 }
  0x69   :  { %p3047_p11 = por %p3046_p10, %p3045_p9 }
  0x6a   :  { %2492 = vmatmul.mubr.msk.f32.gmra.mrb[18].mxu0 %vm65_vm3, %v277_v9  ;;  %v2698_v9 = vpack.c.bf16 %v1344_v8, %v1342_v7  ;;  %v1505_v7 = vld [vmem:[#allocation6 + $0x158] sm:$0xff] }
  0x6b   :  { %627 = vmatprep.mubr.f32.mxu0 %v3069_v0  ;;  %p3048_p12 = pnand %p3047_p11, %p3041_p8 }
  0x6c   :  { %2699 = vmatpush1.bf16.msra.mxu1 %v2698_v9 }
  0x6d   :  { %2701 = vmatprep.subr.bf16.mxu1 %v2700_v13  ;;  %v2722_v13 = vpack.c.bf16 %v1500_v3, %v1498_v2 }
  0x6e   :  { %2503 = vmatmul.mubr.msk.f32.vlgmr.msra.gmra.mrb[0].mxu0 %vm65_vm3, %v508_v15  ;;  %v1348_v15 = vld [vmem:[#allocation6 + $0x90] sm:$0xff] }
  0x6f   :  { %2667 = vmatpush1.bf16.msra.mxu0 %v2666_v16  ;;  %633 = vmatprep.mubr.f32.mxu0 %v3069_v0  ;;  %v2702_v16 = vpack.c.bf16 %v1348_v15, %v1346_v14  ;;  %v1502_v14 = vld [vmem:[#allocation6 + $0x140] sm:$0xff]  ;;  %v1504_v15 = vld [vmem:[#allocation6 + $0x150] sm:$0xff] }
  0x70   :  { %2670 = vmatprep.subr.msk.bf16.mxu0 %vm3156_vm2, %v2668_v17  ;;  %v1351_v17 = vld [vmem:[#allocation6 + $0xa8] sm:$0xff] }
  0x71   :  { %2703 = vmatpush1.bf16.msra.mxu1 %v2702_v16  ;;  %v2704_v19 = vpack.c.bf16 %v1353_v18, %v1351_v17  ;;  %v2724_v18 = vpack.c.bf16 %v1505_v7, %v1503_v6  ;;  %v1518_v6 = vld [vmem:[#allocation6 + $0x1c0] sm:$0xff]  ;;  %v1520_v7 = vld [vmem:[#allocation6 + $0x1d0] sm:$0xff] }
  0x72   :  { %2504 = vmatmul.mubr.msk.f32.gmra.mrb[2].mxu0 %vm65_vm3, %v509_v22  ;;  %v2706_v22 = vpack.c.bf16 %v1352_v21, %v1350_v20  ;;  %v1507_v21 = vld [vmem:[#allocation6 + $0x168] sm:$0xff] }
  0x73   :  { %639 = vmatprep.mubr.f32.mxu0 %v3069_v0  ;;  %2673 = vmatpush1.bf16.msk.msra.mxu0 %vm3156_vm2, %v2671_v23  ;;  %v1355_v23 = vld [vmem:[#allocation6 + $0xc8] sm:$0xff] }
  0x74   :  { %2675 = vmatprep.subr.bf16.mxu0 %v2674_v24  ;;  %2705 = vmatprep.subr.bf16.mxu1 %v2704_v19  ;;  %v1357_v24 = vld [vmem:[#allocation6 + $0xd8] sm:$0xff] }
  0x75   :  { %2707 = vmatpush1.bf16.msra.mxu1 %v2706_v22  ;;  %v1509_v22 = vld [vmem:[#allocation6 + $0x178] sm:$0xff] }
  0x76   :  { %2505 = vmatmul.mubr.msk.f32.gmra.mrb[4].mxu0 %vm65_vm3, %v510_v25  ;;  %v2708_v25 = vpack.c.bf16 %v1357_v24, %v1355_v23 }
  0x77   :  { %645 = vmatprep.mubr.f32.mxu0 %v3069_v0 }
  0x78   :  { %2709 = vmatprep.subr.bf16.mxu1 %v2708_v25  ;;  %v2726_v25 = vpack.c.bf16 %v1504_v15, %v1502_v14 }
  0x7a   :  { %2506 = vmatmul.mubr.msk.f32.gmra.mrb[6].mxu0 %vm65_vm3, %v511_v26  ;;  %v1354_v26 = vld [vmem:[#allocation6 + $0xc0] sm:$0xff] }
  0x7b   :  { %651 = vmatprep.mubr.f32.mxu0 %v3069_v0 }
  0x7e   :  { %2507 = vmatmul.mubr.msk.f32.gmra.mrb[8].mxu0 %vm65_vm3, %v512_v27  ;;  %v1356_v27 = vld [vmem:[#allocation6 + $0xd0] sm:$0xff] }
  0x7f   :  { %657 = vmatprep.mubr.f32.mxu0 %v3069_v0 }
  0x82   :  { %2508 = vmatmul.mubr.msk.f32.gmra.mrb[10].mxu0 %vm65_vm3, %v513_v28  ;;  %v2710_v28 = vpack.c.bf16 %v1356_v27, %v1354_v26 }
  0x83   :  { %663 = vmatprep.mubr.f32.mxu0 %v3069_v0 }
  0x84   :  { %2711 = vmatpush1.bf16.msra.mxu1 %v2710_v28 }
  0x86   :  { %2509 = vmatmul.mubr.msk.f32.gmra.mrb[12].mxu0 %vm65_vm3, %v514_v29  ;;  %v1359_v29 = vld [vmem:[#allocation6 + $0xe8] sm:$0xff] }
  0x87   :  { %669 = vmatprep.mubr.f32.mxu0 %v3069_v0 }
  0x8a   :  { %2510 = vmatmul.mubr.msk.f32.gmra.mrb[14].mxu0 %vm65_vm3, %v515_v30  ;;  %v1361_v30 = vld [vmem:[#allocation6 + $0xf8] sm:$0xff] }
  0x8b   :  { %675 = vmatprep.mubr.f32.mxu0 %v3069_v0 }
  0x8e   :  { %2511 = vmatmul.mubr.msk.f32.gmra.mrb[16].mxu0 %vm65_vm3, %v516_v31  ;;  %v2712_v31 = vpack.c.bf16 %v1361_v30, %v1359_v29  ;;  %v2728_v30 = vpack.c.bf16 %v1509_v22, %v1507_v21  ;;  %v1522_v22 = vld [vmem:[#allocation6 + $0x1e0] sm:$0xff] }
  0x8f   :  { %681 = vmatprep.mubr.f32.mxu0 %v3069_v0 }
  0x90   :  { %2713 = vmatprep.subr.bf16.mxu1 %v2712_v31  ;;  %v1506_v31 = vld [vmem:[#allocation6 + $0x160] sm:$0xff] }
  0x92   :  { %2512 = vmatmul.mubr.msk.f32.gmra.mrb[18].mxu0 %vm65_vm3, %v517_v32  ;;  %v1358_v32 = vld [vmem:[#allocation6 + $0xe0] sm:$0xff] }
  0x93   :  { %867 = vmatprep.mubr.f32.mxu0 %v3069_v0  ;;  %v2714_v34 = vpack.c.bf16 %v1360_v33, %v1358_v32  ;;  %v1508_v32 = vld [vmem:[#allocation6 + $0x170] sm:$0xff] }
  0x95   :  { %2715 = vmatpush1.bf16.msra.mxu1 %v2714_v34  ;;  %v1511_v34 = vld [vmem:[#allocation6 + $0x188] sm:$0xff] }
  0x96   :  { %2523 = vmatmul.mubr.msk.f32.vlgmr.msra.gmra.mrb[0].mxu0 %vm65_vm3, %v748_v37  ;;  %v2716_v37 = vpack.c.bf16 %v1497_v36, %v1495_v35  ;;  %v1513_v35 = vld [vmem:[#allocation6 + $0x198] sm:$0xff] }
  0x97   :  { %2677 = vmatpush1.bf16.msra.mxu0 %v2676_v38  ;;  %873 = vmatprep.mubr.f32.mxu0 %v3069_v0 }
  0x98   :  { %2680 = vmatprep.subr.msk.bf16.mxu0 %vm3156_vm2, %v2678_v39  ;;  %2717 = vmatprep.subr.bf16.mxu1 %v2716_v37 }
  0x9a   :  { %2524 = vmatmul.mubr.msk.f32.gmra.mrb[2].mxu0 %vm65_vm3, %v749_v42 }
  0x9b   :  { %879 = vmatprep.mubr.f32.mxu0 %v3069_v0  ;;  %2683 = vmatpush1.bf16.msk.msra.mxu0 %vm3156_vm2, %v2681_v43 }
  0x9e   :  { %2525 = vmatmul.mubr.msk.f32.gmra.mrb[4].mxu0 %vm65_vm3, %v750_v44 }
  0x9f   :  { %885 = vmatprep.mubr.f32.mxu0 %v3069_v0 }
  0xa2   :  { %2526 = vmatmul.mubr.msk.f32.gmra.mrb[6].mxu0 %vm65_vm3, %v751_v45 }
  0xa3   :  { %891 = vmatprep.mubr.f32.mxu0 %v3069_v0 }
  0xa6   :  { %2527 = vmatmul.mubr.msk.f32.gmra.mrb[8].mxu0 %vm65_vm3, %v752_v46 }
  0xa7   :  { %897 = vmatprep.mubr.f32.mxu0 %v3069_v0 }
  0xaa   :  { %2528 = vmatmul.mubr.msk.f32.gmra.mrb[10].mxu0 %vm65_vm3, %v753_v10 }
  0xab   :  { %903 = vmatprep.mubr.f32.mxu0 %v3069_v0 }
  0xae   :  { %2529 = vmatmul.mubr.msk.f32.gmra.mrb[12].mxu0 %vm65_vm3, %v754_v47 }
  0xaf   :  { %909 = vmatprep.mubr.f32.mxu0 %v3069_v0 }
  0xb2   :  { %2530 = vmatmul.mubr.msk.f32.gmra.mrb[14].mxu0 %vm65_vm3, %v755_v48  ;;  %v3535_v48 = vld [vmem:[%s3711_s2] ss:$0 sm:$0xff] }
  0xb3   :  { %915 = vmatprep.mubr.f32.mxu0 %v3069_v0 }
  0xb6   :  { %2531 = vmatmul.mubr.msk.f32.gmra.mrb[16].mxu0 %vm65_vm3, %v756_v49 }
  0xb7   :  { %921 = vmatprep.mubr.f32.mxu0 %v3069_v0 }
  0xba   :  { %2532 = vmatmul.mubr.msk.f32.gmra.mrb[18].mxu0 %vm65_vm3, %v757_v50 }
  0xbb   :  { %1107 = vmatprep.mubr.f32.mxu0 %v3069_v0 }
  0xbe   :  { %2543 = vmatmul.mubr.msk.f32.vlgmr.msra.gmra.mrb[0].mxu0 %vm65_vm3, %v988_v51  ;;  %v1494_v51 = vld [vmem:[#allocation6 + $0x100] sm:$0xff] }
  0xbf   :  { %1113 = vmatprep.mubr.f32.mxu0 %v3069_v0 }
  0xc2   :  { %2544 = vmatmul.mubr.msk.f32.gmra.mrb[2].mxu0 %vm65_vm3, %v989_v52  ;;  %v1496_v52 = vld [vmem:[#allocation6 + $0x110] sm:$0xff] }
  0xc3   :  { %1119 = vmatprep.mubr.f32.mxu0 %v3069_v0  ;;  %v2718_v61 = vpack.c.bf16 %v1496_v52, %v1494_v51 }
  0xc6   :  { %2545 = vmatmul.mubr.msk.f32.gmra.mrb[4].mxu0 %vm65_vm3, %v990_v53 }
  0xc7   :  { %1125 = vmatprep.mubr.f32.mxu0 %v3069_v0 }
  0xca   :  { %2546 = vmatmul.mubr.msk.f32.gmra.mrb[6].mxu0 %vm65_vm3, %v991_v54 }
  0xcb   :  { %1131 = vmatprep.mubr.f32.mxu0 %v3069_v0 }
  0xce   :  { %2547 = vmatmul.mubr.msk.f32.gmra.mrb[8].mxu0 %vm65_vm3, %v992_v55  ;;  %v1499_v55 = vld [vmem:[#allocation6 + $0x128] sm:$0xff] }
  0xcf   :  { %1137 = vmatprep.mubr.f32.mxu0 %v3069_v0 }
  0xd2   :  { %2548 = vmatmul.mubr.msk.f32.gmra.mrb[10].mxu0 %vm65_vm3, %v993_v56  ;;  %v1501_v56 = vld [vmem:[#allocation6 + $0x138] sm:$0xff] }
  0xd3   :  { %1143 = vmatprep.mubr.f32.mxu0 %v3069_v0  ;;  %v2720_v1 = vpack.c.bf16 %v1501_v56, %v1499_v55  ;;  %v1514_v55 = vld [vmem:[#allocation6 + $0x1a0] sm:$0xff]  ;;  %v1516_v56 = vld [vmem:[#allocation6 + $0x1b0] sm:$0xff] }
  0xd4   :  { %v2738_v2 = vpack.c.bf16 %v1516_v56, %v1514_v55 }
  0xd6   :  { %2549 = vmatmul.mubr.msk.f32.gmra.mrb[12].mxu0 %vm65_vm3, %v994_v57 }
  0xd7   :  { %1149 = vmatprep.mubr.f32.mxu0 %v3069_v0 }
  0xda   :  { %2550 = vmatmul.mubr.msk.f32.gmra.mrb[14].mxu0 %vm65_vm3, %v995_v58 }
  0xdb   :  { %1155 = vmatprep.mubr.f32.mxu0 %v3069_v0 }
  0xde   :  { %2551 = vmatmul.mubr.msk.f32.gmra.mrb[16].mxu0 %vm65_vm3, %v996_v59 }
  0xdf   :  { %1161 = vmatprep.mubr.f32.mxu0 %v3069_v0 }
  0xe2   :  { %2552 = vmatmul.mubr.msk.f32.gmra.mrb[18].mxu0 %vm65_vm3, %v997_v60 }
 0x191   :  { %v1109_v38 = vpop.f32.mrb[0].mxu0 }
 0x192   :  { %v1111_v39 = vpop.f32.mrb[1].mxu0 }
 0x193   :  { %v1228_v40 = vmax.f32 %v1109_v38, %v1111_v39  ;;  %v2730_v39 = vpack.c.bf16 %v1508_v32, %v1506_v31 }
 0x195   :  { %v1115_v41 = vpop.f32.mrb[2].mxu0  ;;  %v1249_v44 = vrot.slane %v1228_v40, 1 }
 0x196   :  { %v1117_v42 = vpop.f32.mrb[3].mxu0 }
 0x197   :  { %v1229_v43 = vmax.f32 %v1115_v41, %v1117_v42  ;;  %v2732_v41 = vpack.c.bf16 %v1513_v35, %v1511_v34  ;;  %v1510_v42 = vld [vmem:[#allocation6 + $0x180] sm:$0xff]  ;;  %v1672_v35 = vld [vmem:[#allocation6 + $0x210] sm:$0xff] }
 0x198   :  { %v1670_v34 = vld [vmem:[#allocation6 + $0x200] sm:$0xff] }
 0x199   :  { %v1250_v45 = vrot.slane %v1229_v43, 1  ;;  %v1121_v46 = vpop.f32.mrb[4].mxu0 }
 0x19a   :  { %v1123_v10 = vpop.f32.mrb[5].mxu0 }
 0x19b   :  { %v1251_v47 = vsel %vm1248_vm4, %v1249_v44, %v1250_v45  ;;  %v1230_v49 = vmax.f32 %v1121_v46, %v1123_v10  ;;  %v1515_v10 = vld [vmem:[#allocation6 + $0x1a8] sm:$0xff] }
 0x19c   :  { %v1277_v50 = vmax.f32 %v1228_v40, %v1251_v47  ;;  %v1517_v47 = vld [vmem:[#allocation6 + $0x1b8] sm:$0xff] }
 0x19d   :  { %v1252_v53 = vrot.slane %v1230_v49, 1  ;;  %v1127_v54 = vpop.f32.mrb[6].mxu0 }
 0x19e   :  { %v1294_v57 = vadd.f32 %v3535_v48, %v1277_v50  ;;  %v1129_v58 = vpop.f32.mrb[7].mxu0 }
 0x19f   :  { %v1253_v59 = vsel %vm1248_vm4, %v1250_v45, %v1252_v53  ;;  %v1231_v60 = vmax.f32 %v1127_v54, %v1129_v58  ;;  %v2736_v54 = vpack.c.bf16 %v1517_v47, %v1515_v10  ;;  %v1679_v10 = vld [vmem:[#allocation6 + $0x248] sm:$0xff]  ;;  %v1681_v47 = vld [vmem:[#allocation6 + $0x258] sm:$0xff] }
 0x1a0   :  { %v1304_v62 = vmax.f32 %v1294_v57, 0.0  ;;  %v1278_v63 = vmax.f32 %v1229_v43, %v1253_v59  ;;  %v1512_v43 = vld [vmem:[#allocation6 + $0x190] sm:$0xff]  ;;  %v1519_v59 = vld [vmem:[#allocation6 + $0x1c8] sm:$0xff] }
 0x1a1   :  { %v1254_v4 = vrot.slane %v1231_v60, 1  ;;  %v1133_v5 = vpop.f32.mrb[8].mxu0  ;;  %v2734_v52 = vpack.c.bf16 %v1512_v43, %v1510_v42 }
 0x1a2   :  { %1314 = vst [vmem:[#allocation3] sm:$0xff] %v1304_v62  ;;  %v1295_v8 = vadd.f32 %v3535_v48, %v1278_v63  ;;  %v1135_v9 = vpop.f32.mrb[9].mxu0  ;;  %1427 = vmatmul.mubr.f32.vlgmr.msra.gmra.mrb[0].mxu1 %v1304_v62 }
 0x1a3   :  { %v1255_v11 = vsel %vm1248_vm4, %v1252_v53, %v1254_v4  ;;  %v1232_v12 = vmax.f32 %v1133_v5, %v1135_v9  ;;  %2719 = vmatpush1.bf16.msra.mxu1 %v2718_v61  ;;  %1432 = vmatprep.mubr.f32.mxu1 %v3069_v0 }
 0x1a4   :  { %v3542_v16 = vmax.f32 %v1295_v8, 0.0  ;;  %v1279_v17 = vmax.f32 %v1230_v49, %v1255_v11  ;;  %2721 = vmatprep.subr.bf16.mxu1 %v2720_v1  ;;  %v1523_v11 = vld [vmem:[#allocation6 + $0x1e8] sm:$0xff] }
 0x1a5   :  { %v1256_v19 = vrot.slane %v1232_v12, 1  ;;  %v1139_v20 = vpop.f32.mrb[10].mxu0  ;;  %v1525_v12 = vld [vmem:[#allocation6 + $0x1f8] sm:$0xff] }
 0x1a6   :  { %1315 = vst [vmem:[#allocation3 + $0x8] sm:$0xff] %v3542_v16  ;;  %v1296_v23 = vadd.f32 %v3535_v48, %v1279_v17  ;;  %v1141_v24 = vpop.f32.mrb[11].mxu0  ;;  %1433 = vmatmul.mubr.f32.gmra.mrb[2].mxu1 %v3542_v16  ;;  %v2744_v21 = vpack.c.bf16 %v1525_v12, %v1523_v11  ;;  %v1695_v12 = vld [vmem:[#allocation6 + $0x2c8] sm:$0xff] }
 0x1a7   :  { %v1257_v26 = vsel %vm1248_vm4, %v1254_v4, %v1256_v19  ;;  %v1233_v27 = vmax.f32 %v1139_v20, %v1141_v24  ;;  %2723 = vmatpush1.bf16.msra.mxu1 %v2722_v13  ;;  %1438 = vmatprep.mubr.f32.mxu1 %v3069_v0 }
 0x1a8   :  { %v3549_v28 = vmax.f32 %v1296_v23, 0.0  ;;  %v1280_v29 = vmax.f32 %v1231_v60, %v1257_v26  ;;  %2725 = vmatprep.subr.bf16.mxu1 %v2724_v18  ;;  %v1521_v60 = vld [vmem:[#allocation6 + $0x1d8] sm:$0xff]  ;;  %v2742_v18 = vpack.c.bf16 %v1520_v7, %v1518_v6  ;;  %v1524_v23 = vld [vmem:[#allocation6 + $0x1f0] sm:$0xff] }
 0x1a9   :  { %v1145_v33 = vpop.f32.mrb[12].mxu0  ;;  %v1258_v44 = vrot.slane %v1233_v27, 1  ;;  %v2740_v5 = vpack.c.bf16 %v1521_v60, %v1519_v59  ;;  %v1673_v26 = vld [vmem:[#allocation6 + $0x218] sm:$0xff]  ;;  %v1687_v60 = vld [vmem:[#allocation6 + $0x288] sm:$0xff] }
 0x1aa   :  { %1316 = vst [vmem:[#allocation3 + $0x10] sm:$0xff] %v3549_v28  ;;  %v3553_v36 = vadd.f32 %v3535_v48, %v1280_v29  ;;  %v1147_v37 = vpop.f32.mrb[13].mxu0  ;;  %1439 = vmatmul.mubr.f32.gmra.mrb[4].mxu1 %v3549_v28 }
 0x1ab   :  { %v1234_v38 = vmax.f32 %v1145_v33, %v1147_v37  ;;  %2727 = vmatpush1.bf16.msra.mxu1 %v2726_v25  ;;  %1444 = vmatprep.mubr.f32.mxu1 %v3069_v0  ;;  %v1671_v25 = vld [vmem:[#allocation6 + $0x208] sm:$0xff] }
 0x1ac   :  { %v1307_v40 = vmax.f32 %v3553_v36, 0.0  ;;  %2729 = vmatprep.subr.bf16.mxu1 %v2728_v30  ;;  %v2746_v30 = vpack.c.bf16 %v1524_v23, %v1522_v22  ;;  %v2748_v33 = vpack.c.bf16 %v1673_v26, %v1671_v25  ;;  %v1675_v37 = vld [vmem:[#allocation6 + $0x228] sm:$0xff]  ;;  %v1701_v22 = vld [vmem:[#allocation6 + $0x2f8] sm:$0xff]  ;;  %v1698_v25 = vld [vmem:[#allocation6 + $0x2e0] sm:$0xff] }
 0x1ad   :  { %v1259_v45 = vrot.slane %v1234_v38, 1  ;;  %v1151_v46 = vpop.f32.mrb[14].mxu0  ;;  %v1700_v26 = vld [vmem:[#allocation6 + $0x2f0] sm:$0xff] }
 0x1ae   :  { %1317 = vst [vmem:[#allocation3 + $0x18] sm:$0xff] %v1307_v40  ;;  %v1153_v49 = vpop.f32.mrb[15].mxu0 }
 0x1af   :  { %v1260_v50 = vsel %vm1248_vm4, %v1258_v44, %v1259_v45  ;;  %v1235_v51 = vmax.f32 %v1151_v46, %v1153_v49  ;;  %2731 = vmatpush1.bf16.msra.mxu1 %v2730_v39  ;;  %v1674_v44 = vld [vmem:[#allocation6 + $0x220] sm:$0xff]  ;;  %v2756_v49 = vpack.c.bf16 %v1681_v47, %v1679_v10  ;;  %v1857_v10 = vld [vmem:[#allocation6 + $0x358] sm:$0xff] }
 0x1b0   :  { %v1282_v53 = vmax.f32 %v1233_v27, %v1260_v50  ;;  %2733 = vmatprep.subr.bf16.mxu1 %v2732_v41  ;;  %v2750_v41 = vpack.c.bf16 %v1672_v35, %v1670_v34  ;;  %v1487_v46 = vld [vmem:[#allocation3 + $0x2] sm:$0xff]  ;;  %v1848_v34 = vld [vmem:[#allocation6 + $0x310] sm:$0xff] }
 0x1b1   :  { %v1261_v57 = vrot.slane %v1235_v51, 1  ;;  %v1157_v58 = vpop.f32.mrb[16].mxu0  ;;  %v1678_v50 = vld [vmem:[#allocation6 + $0x240] sm:$0xff]  ;;  %v1851_v35 = vld [vmem:[#allocation6 + $0x328] sm:$0xff] }
 0x1b2   :  { %v1299_v61 = vadd.f32 %v3535_v48, %v1282_v53  ;;  %v1159_v62 = vpop.f32.mrb[17].mxu0  ;;  %v1683_v53 = vld [vmem:[#allocation6 + $0x268] sm:$0xff] }
 0x1b3   :  { %v1262_v63 = vsel %vm1248_vm4, %v1259_v45, %v1261_v57  ;;  %v1236_v1 = vmax.f32 %v1157_v58, %v1159_v62  ;;  %2735 = vmatpush1.bf16.msra.mxu1 %v2734_v52  ;;  %v1676_v45 = vld [vmem:[#allocation6 + $0x230] sm:$0xff] }
 0x1b4   :  { %v1309_v3 = vmax.f32 %v1299_v61, 0.0  ;;  %v1283_v4 = vmax.f32 %v1234_v38, %v1262_v63  ;;  %2737 = vmatprep.subr.bf16.mxu1 %v2736_v54  ;;  %v1677_v38 = vld [vmem:[#allocation6 + $0x238] sm:$0xff]  ;;  %v1488_v52 = vld [vmem:[#allocation3 + $0xa] sm:$0xff] }
 0x1b5   :  { %v1263_v8 = vrot.slane %v1236_v1, 1  ;;  %v1163_v9 = vpop.f32.mrb[18].mxu0  ;;  %v2752_v43 = vpack.c.bf16 %v1677_v38, %v1675_v37  ;;  %v1685_v54 = vld [vmem:[#allocation6 + $0x278] sm:$0xff]  ;;  %v1684_v58 = vld [vmem:[#allocation6 + $0x270] sm:$0xff] }
 0x1b6   :  { %1319 = vst [vmem:[#allocation3 + $0x28] sm:$0xff] %v1309_v3  ;;  %v1300_v13 = vadd.f32 %v3535_v48, %v1283_v4  ;;  %v1165_v14 = vpop.f32.mrb[19].mxu0  ;;  %1445 = vmatmul.mubr.f32.gmra.mrb[6].mxu1 %v1309_v3  ;;  %v2760_v56 = vpack.c.bf16 %v1685_v54, %v1683_v53  ;;  %v1489_v59 = vld [vmem:[#allocation3 + $0x12] sm:$0xff]  ;;  %v1691_v4 = vld [vmem:[#allocation6 + $0x2a8] sm:$0xff] }
 0x1b7   :  { %v1264_v15 = vsel %vm1248_vm4, %v1261_v57, %v1263_v8  ;;  %v1237_v17 = vmax.f32 %v1163_v9, %v1165_v14  ;;  %2739 = vmatpush1.bf16.msra.mxu1 %v2738_v2  ;;  %1450 = vmatprep.mubr.f32.mxu1 %v3069_v0  ;;  %v1682_v57 = vld [vmem:[#allocation6 + $0x260] sm:$0xff]  ;;  %v1689_v61 = vld [vmem:[#allocation6 + $0x298] sm:$0xff]  ;;  %v1688_v2 = vld [vmem:[#allocation6 + $0x290] sm:$0xff] }
 0x1b8   :  { %v3566_v19 = vmax.f32 %v1300_v13, 0.0  ;;  %v1284_v20 = vmax.f32 %v1235_v51, %v1264_v15  ;;  %2741 = vmatprep.subr.bf16.mxu1 %v2740_v5  ;;  %v1680_v51 = vld [vmem:[#allocation6 + $0x250] sm:$0xff]  ;;  %v2762_v62 = vpack.c.bf16 %v1684_v58, %v1682_v57  ;;  %v2764_v63 = vpack.c.bf16 %v1689_v61, %v1687_v60  ;;  %v1693_v5 = vld [vmem:[#allocation6 + $0x2b8] sm:$0xff] }
 0x1b9   :  { %v1265_v24 = vrot.slane %v1237_v17, 1  ;;  %v2758_v55 = vpack.c.bf16 %v1680_v51, %v1678_v50  ;;  %v2768_v7 = vpack.c.bf16 %v1693_v5, %v1691_v4  ;;  %v1692_v9 = vld [vmem:[#allocation6 + $0x2b0] sm:$0xff]  ;;  %v1697_v13 = vld [vmem:[#allocation6 + $0x2d8] sm:$0xff]  ;;  %v1694_v17 = vld [vmem:[#allocation6 + $0x2c0] sm:$0xff] }
 0x1ba   :  { %1320 = vst [vmem:[#allocation3 + $0x30] sm:$0xff] %v3566_v19  ;;  %v1301_v27 = vadd.f32 %v3535_v48, %v1284_v20  ;;  %1451 = vmatmul.mubr.f32.gmra.mrb[8].mxu1 %v3566_v19  ;;  %v2772_v15 = vpack.c.bf16 %v1697_v13, %v1695_v12  ;;  %v1853_v37 = vld [vmem:[#allocation6 + $0x338] sm:$0xff]  ;;  %v1856_v50 = vld [vmem:[#allocation6 + $0x350] sm:$0xff] }
 0x1bb   :  { %v1266_v29 = vsel %vm1248_vm4, %v1263_v8, %v1265_v24  ;;  %2743 = vmatpush1.bf16.msra.mxu1 %v2742_v18  ;;  %1456 = vmatprep.mubr.f32.mxu1 %v3069_v0  ;;  %v1690_v8 = vld [vmem:[#allocation6 + $0x2a0] sm:$0xff]  ;;  %v1696_v18 = vld [vmem:[#allocation6 + $0x2d0] sm:$0xff]  ;;  %v1861_v53 = vld [vmem:[#allocation6 + $0x378] sm:$0xff] }
 0x1bc   :  { %v3573_v31 = vmax.f32 %v1301_v27, 0.0  ;;  %v1285_v32 = vmax.f32 %v1236_v1, %v1266_v29  ;;  %2745 = vmatprep.subr.bf16.mxu1 %v2744_v21  ;;  %v1686_v1 = vld [vmem:[#allocation6 + $0x280] sm:$0xff]  ;;  %v2770_v14 = vpack.c.bf16 %v1692_v9, %v1690_v8  ;;  %v1699_v21 = vld [vmem:[#allocation6 + $0x2e8] sm:$0xff]  ;;  %v2774_v23 = vpack.c.bf16 %v1696_v18, %v1694_v17  ;;  %v1849_v29 = vld [vmem:[#allocation6 + $0x318] sm:$0xff] }
 0x1bd   :  { %v2766_v6 = vpack.c.bf16 %v1688_v2, %v1686_v1  ;;  %v2776_v24 = vpack.c.bf16 %v1701_v22, %v1699_v21  ;;  %v1847_v27 = vld [vmem:[#allocation6 + $0x308] sm:$0xff]  ;;  %v1860_v57 = vld [vmem:[#allocation6 + $0x370] sm:$0xff]  ;;  %v1865_v60 = vld [vmem:[#allocation6 + $0x398] sm:$0xff] }
 0x1be   :  { %1321 = vst [vmem:[#allocation3 + $0x38] sm:$0xff] %v3573_v31  ;;  %v3577_v39 = vadd.f32 %v3535_v48, %v1285_v32  ;;  %1457 = vmatmul.mubr.f32.gmra.mrb[10].mxu1 %v3573_v31  ;;  %v2754_v48 = vpack.c.bf16 %v1676_v45, %v1674_v44  ;;  %v2780_v32 = vpack.c.bf16 %v1849_v29, %v1847_v27  ;;  %v1852_v44 = vld [vmem:[#allocation6 + $0x330] sm:$0xff]  ;;  %v1663_v45 = vld [vmem:[#allocation3 + $0x4] sm:$0xff]  ;;  %v1869_v4 = vld [vmem:[#allocation6 + $0x3b8] sm:$0xff] }
 0x1bf   :  { %2747 = vmatpush1.bf16.msra.mxu1 %v2746_v30  ;;  %1590 = vmatprep.mubr.f32.mxu1 %v3069_v0  ;;  %v2778_v30 = vpack.c.bf16 %v1700_v26, %v1698_v25  ;;  %v1664_v51 = vld [vmem:[#allocation3 + $0xc] sm:$0xff]  ;;  %v1665_v58 = vld [vmem:[#allocation3 + $0x14] sm:$0xff] }
 0x1c0   :  { %v1312_v42 = vmax.f32 %v3577_v39, 0.0  ;;  %2749 = vmatprep.subr.bf16.mxu1 %v2748_v33  ;;  %v1846_v33 = vld [vmem:[#allocation6 + $0x300] sm:$0xff]  ;;  %v1864_v1 = vld [vmem:[#allocation6 + $0x390] sm:$0xff]  ;;  %v1873_v12 = vld [vmem:[#allocation6 + $0x3d8] sm:$0xff] }
 0x1c1   :  { %v1490_v3 = vld [vmem:[#allocation3 + $0x2a] sm:$0xff]  ;;  %v2782_v38 = vpack.c.bf16 %v1848_v34, %v1846_v33  ;;  %v1877_v21 = vld [vmem:[#allocation6 + $0x3f8] sm:$0xff]  ;;  %v2238_v39 = vld [vmem:[%s3714_s5 + $0x40] sm:$0xff] }
 0x1c2   :  { %1322 = vst [vmem:[#allocation3 + $0x40] sm:$0xff] %v1312_v42  ;;  %1591 = vmatmul.mubr.f32.vlgmr.msra.gmra.mrb[0].mxu1 %v1487_v46  ;;  %v1855_v46 = vld [vmem:[#allocation6 + $0x348] sm:$0xff]  ;;  %v1868_v8 = vld [vmem:[#allocation6 + $0x3b0] sm:$0xff]  ;;  %v2025_v27 = vld [vmem:[#allocation6 + $0x418] sm:$0xff] }
 0x1c3   :  { %2751 = vmatpush1.bf16.msra.mxu1 %v2750_v41  ;;  %1596 = vmatprep.mubr.f32.mxu1 %v3069_v0  ;;  %v2784_v41 = vpack.c.bf16 %v1853_v37, %v1851_v35  ;;  %v1666_v2 = vld [vmem:[#allocation3 + $0x2c] sm:$0xff]  ;;  %v2029_v35 = vld [vmem:[#allocation6 + $0x438] sm:$0xff] }
 0x1c4   :  { %2753 = vmatprep.subr.bf16.mxu1 %v2752_v43  ;;  %v1850_v43 = vld [vmem:[#allocation6 + $0x320] sm:$0xff]  ;;  %v1872_v17 = vld [vmem:[#allocation6 + $0x3d0] sm:$0xff]  ;;  %v2023_v26 = vld [vmem:[#allocation6 + $0x408] sm:$0xff] }
 0x1c5   :  { %v1491_v11 = vld [vmem:[#allocation3 + $0x32] sm:$0xff]  ;;  %v2786_v47 = vpack.c.bf16 %v1852_v44, %v1850_v43  ;;  %v2027_v34 = vld [vmem:[#allocation6 + $0x428] sm:$0xff] }
 0x1c6   :  { %1597 = vmatmul.mubr.f32.gmra.mrb[2].mxu1 %v1488_v52  ;;  %v1859_v52 = vld [vmem:[#allocation6 + $0x368] sm:$0xff]  ;;  %v1667_v9 = vld [vmem:[#allocation3 + $0x34] sm:$0xff] }
 0x1c7   :  { %2755 = vmatpush1.bf16.msra.mxu1 %v2754_v48  ;;  %1602 = vmatprep.mubr.f32.mxu1 %v3069_v0  ;;  %v2788_v48 = vpack.c.bf16 %v1857_v10, %v1855_v46  ;;  %v1876_v25 = vld [vmem:[#allocation6 + $0x3f0] sm:$0xff]  ;;  %v1839_v44 = vld [vmem:[#allocation3 + $0x6] sm:$0xff]  ;;  %v2033_v46 = vld [vmem:[#allocation6 + $0x458] sm:$0xff] }
 0x1c8   :  { %2757 = vmatprep.subr.bf16.mxu1 %v2756_v49  ;;  %v1854_v49 = vld [vmem:[#allocation6 + $0x340] sm:$0xff]  ;;  %v2024_v33 = vld [vmem:[#allocation6 + $0x410] sm:$0xff] }
 0x1c9   :  { %v1492_v20 = vld [vmem:[#allocation3 + $0x3a] sm:$0xff]  ;;  %v2790_v54 = vpack.c.bf16 %v1856_v50, %v1854_v49  ;;  %v2028_v43 = vld [vmem:[#allocation6 + $0x430] sm:$0xff] }
 0x1ca   :  { %1603 = vmatmul.mubr.f32.gmra.mrb[4].mxu1 %v1489_v59  ;;  %v1863_v59 = vld [vmem:[#allocation6 + $0x388] sm:$0xff]  ;;  %v1668_v18 = vld [vmem:[#allocation3 + $0x3c] sm:$0xff]  ;;  %v2032_v49 = vld [vmem:[#allocation6 + $0x450] sm:$0xff] }
 0x1cb   :  { %2759 = vmatpush1.bf16.msra.mxu1 %v2758_v55  ;;  %1608 = vmatprep.mubr.f32.mxu1 %v3069_v0  ;;  %v2792_v55 = vpack.c.bf16 %v1861_v53, %v1859_v52  ;;  %v1840_v50 = vld [vmem:[#allocation3 + $0xe] sm:$0xff]  ;;  %v2037_v52 = vld [vmem:[#allocation6 + $0x478] sm:$0xff] }
 0x1cc   :  { %2761 = vmatprep.subr.bf16.mxu1 %v2760_v56  ;;  %v1858_v56 = vld [vmem:[#allocation6 + $0x360] sm:$0xff] }
 0x1cd   :  { %v2794_v61 = vpack.c.bf16 %v1860_v57, %v1858_v56  ;;  %v2036_v56 = vld [vmem:[#allocation6 + $0x470] sm:$0xff] }
 0x1ce   :  { %1609 = vmatmul.mubr.f32.gmra.mrb[6].mxu1 %v1490_v3  ;;  %v1867_v3 = vld [vmem:[#allocation6 + $0x3a8] sm:$0xff]  ;;  %v1841_v57 = vld [vmem:[#allocation3 + $0x16] sm:$0xff] }
 0x1cf   :  { %2763 = vmatpush1.bf16.msra.mxu1 %v2762_v62  ;;  %1614 = vmatprep.mubr.f32.mxu1 %v3069_v0  ;;  %v2796_v62 = vpack.c.bf16 %v1865_v60, %v1863_v59  ;;  %v2041_v59 = vld [vmem:[#allocation6 + $0x498] sm:$0xff] }
 0x1d0   :  { %2765 = vmatprep.subr.bf16.mxu1 %v2764_v63  ;;  %v1862_v63 = vld [vmem:[#allocation6 + $0x380] sm:$0xff] }
 0x1d1   :  { %v2798_v5 = vpack.c.bf16 %v1864_v1, %v1862_v63  ;;  %v2040_v63 = vld [vmem:[#allocation6 + $0x490] sm:$0xff] }
 0x1d2   :  { %1615 = vmatmul.mubr.f32.gmra.mrb[8].mxu1 %v1491_v11  ;;  %v1871_v11 = vld [vmem:[#allocation6 + $0x3c8] sm:$0xff] }
 0x1d3   :  { %2767 = vmatpush1.bf16.msra.mxu1 %v2766_v6  ;;  %1620 = vmatprep.mubr.f32.mxu1 %v3069_v0  ;;  %v2800_v6 = vpack.c.bf16 %v1869_v4, %v1867_v3  ;;  %v1842_v1 = vld [vmem:[#allocation3 + $0x2e] sm:$0xff]  ;;  %v2045_v3 = vld [vmem:[#allocation6 + $0x4b8] sm:$0xff] }
 0x1d4   :  { %2769 = vmatprep.subr.bf16.mxu1 %v2768_v7  ;;  %v1866_v7 = vld [vmem:[#allocation6 + $0x3a0] sm:$0xff] }
 0x1d5   :  { %v2802_v13 = vpack.c.bf16 %v1868_v8, %v1866_v7  ;;  %v2044_v7 = vld [vmem:[#allocation6 + $0x4b0] sm:$0xff] }
 0x1d6   :  { %1621 = vmatmul.mubr.f32.gmra.mrb[10].mxu1 %v1492_v20  ;;  %v1875_v20 = vld [vmem:[#allocation6 + $0x3e8] sm:$0xff]  ;;  %v1843_v8 = vld [vmem:[#allocation3 + $0x36] sm:$0xff] }
 0x1d7   :  { %2771 = vmatpush1.bf16.msra.mxu1 %v2770_v14  ;;  %1766 = vmatprep.mubr.f32.mxu1 %v3069_v0  ;;  %v2804_v14 = vpack.c.bf16 %v1873_v12, %v1871_v11  ;;  %v2049_v11 = vld [vmem:[#allocation6 + $0x4d8] sm:$0xff] }
 0x1d8   :  { %2773 = vmatprep.subr.bf16.mxu1 %v2772_v15  ;;  %v1870_v15 = vld [vmem:[#allocation6 + $0x3c0] sm:$0xff] }
 0x1d9   :  { %v2806_v22 = vpack.c.bf16 %v1872_v17, %v1870_v15  ;;  %v2048_v15 = vld [vmem:[#allocation6 + $0x4d0] sm:$0xff]  ;;  %v1844_v17 = vld [vmem:[#allocation3 + $0x3e] sm:$0xff] }
 0x1db   :  { %2775 = vmatpush1.bf16.msra.mxu1 %v2774_v23  ;;  %v2808_v23 = vpack.c.bf16 %v1877_v21, %v1875_v20  ;;  %v2053_v20 = vld [vmem:[#allocation6 + $0x4f8] sm:$0xff] }
 0x1dc   :  { %2777 = vmatprep.subr.bf16.mxu1 %v2776_v24  ;;  %v1874_v24 = vld [vmem:[#allocation6 + $0x3e0] sm:$0xff] }
 0x1dd   :  { %v2810_v29 = vpack.c.bf16 %v1876_v25, %v1874_v24  ;;  %v2052_v24 = vld [vmem:[#allocation6 + $0x4f0] sm:$0xff]  ;;  %v2230_v25 = vld [vmem:[%s3714_s5] sm:$0xff] }
 0x1df   :  { %2779 = vmatpush1.bf16.msra.mxu1 %v2778_v30  ;;  %v2812_v30 = vpack.c.bf16 %v2025_v27, %v2023_v26  ;;  %v2231_v26 = vld [vmem:[%s3714_s5 + $0x8] sm:$0xff] }
 0x1e0   :  { %2781 = vmatprep.subr.bf16.mxu1 %v2780_v32  ;;  %v2022_v32 = vld [vmem:[#allocation6 + $0x400] sm:$0xff] }
 0x1e1   :  { %v2814_v37 = vpack.c.bf16 %v2024_v33, %v2022_v32  ;;  %v2233_v32 = vld [vmem:[%s3714_s5 + $0x18] sm:$0xff] }
 0x1e2   :  { %1767 = vmatmul.mubr.f32.vlgmr.msra.gmra.mrb[0].mxu1 %v1663_v45  ;;  %v2031_v45 = vld [vmem:[#allocation6 + $0x448] sm:$0xff] }
 0x1e3   :  { %2783 = vmatpush1.bf16.msra.mxu1 %v2782_v38  ;;  %1772 = vmatprep.mubr.f32.mxu1 %v3069_v0  ;;  %v2816_v38 = vpack.c.bf16 %v2029_v35, %v2027_v34  ;;  %v2240_v35 = vld [vmem:[%s3714_s5 + $0x50] sm:$0xff] }
 0x1e4   :  { %2785 = vmatprep.subr.bf16.mxu1 %v2784_v41  ;;  %v2026_v41 = vld [vmem:[#allocation6 + $0x420] sm:$0xff] }
 0x1e5   :  { %v2818_v10 = vpack.c.bf16 %v2028_v43, %v2026_v41  ;;  %v2242_v41 = vld [vmem:[%s3714_s5 + $0x60] sm:$0xff]  ;;  %v2243_v43 = vld [vmem:[%s3714_s5 + $0x68] sm:$0xff] }
 0x1e6   :  { %1773 = vmatmul.mubr.f32.gmra.mrb[2].mxu1 %v1664_v51  ;;  %v2035_v51 = vld [vmem:[#allocation6 + $0x468] sm:$0xff] }
 0x1e7   :  { %2787 = vmatpush1.bf16.msra.mxu1 %v2786_v47  ;;  %1778 = vmatprep.mubr.f32.mxu1 %v3069_v0  ;;  %v2820_v47 = vpack.c.bf16 %v2033_v46, %v2031_v45  ;;  %v2244_v45 = vld [vmem:[%s3714_s5 + $0x70] sm:$0xff]  ;;  %v2245_v46 = vld [vmem:[%s3714_s5 + $0x78] sm:$0xff] }
 0x1e8   :  { %2789 = vmatprep.subr.bf16.mxu1 %v2788_v48  ;;  %v2030_v48 = vld [vmem:[#allocation6 + $0x440] sm:$0xff] }
 0x1e9   :  { %v2822_v53 = vpack.c.bf16 %v2032_v49, %v2030_v48 }
 0x1ea   :  { %1779 = vmatmul.mubr.f32.gmra.mrb[4].mxu1 %v1665_v58  ;;  %v2039_v58 = vld [vmem:[#allocation6 + $0x488] sm:$0xff] }
 0x1eb   :  { %2791 = vmatpush1.bf16.msra.mxu1 %v2790_v54  ;;  %1784 = vmatprep.mubr.f32.mxu1 %v3069_v0  ;;  %v2824_v54 = vpack.c.bf16 %v2037_v52, %v2035_v51 }
 0x1ec   :  { %2793 = vmatprep.subr.bf16.mxu1 %v2792_v55  ;;  %v2034_v55 = vld [vmem:[#allocation6 + $0x460] sm:$0xff] }
 0x1ed   :  { %v2826_v60 = vpack.c.bf16 %v2036_v56, %v2034_v55 }
 0x1ee   :  { %1785 = vmatmul.mubr.f32.gmra.mrb[6].mxu1 %v1666_v2  ;;  %v2043_v2 = vld [vmem:[#allocation6 + $0x4a8] sm:$0xff] }
 0x1ef   :  { %2795 = vmatpush1.bf16.msra.mxu1 %v2794_v61  ;;  %1790 = vmatprep.mubr.f32.mxu1 %v3069_v0  ;;  %v2828_v61 = vpack.c.bf16 %v2041_v59, %v2039_v58 }
 0x1f0   :  { %2797 = vmatprep.subr.bf16.mxu1 %v2796_v62  ;;  %v2038_v62 = vld [vmem:[#allocation6 + $0x480] sm:$0xff] }
 0x1f1   :  { %v2830_v4 = vpack.c.bf16 %v2040_v63, %v2038_v62 }
 0x1f2   :  { %1791 = vmatmul.mubr.f32.gmra.mrb[8].mxu1 %v1667_v9  ;;  %v2047_v9 = vld [vmem:[#allocation6 + $0x4c8] sm:$0xff] }
 0x1f3   :  { %2799 = vmatpush1.bf16.msra.mxu1 %v2798_v5  ;;  %1796 = vmatprep.mubr.f32.mxu1 %v3069_v0  ;;  %v2832_v5 = vpack.c.bf16 %v2045_v3, %v2043_v2 }
 0x1f4   :  { %2801 = vmatprep.subr.bf16.mxu1 %v2800_v6  ;;  %v2042_v6 = vld [vmem:[#allocation6 + $0x4a0] sm:$0xff] }
 0x1f5   :  { %v2834_v12 = vpack.c.bf16 %v2044_v7, %v2042_v6 }
 0x1f6   :  { %1797 = vmatmul.mubr.f32.gmra.mrb[10].mxu1 %v1668_v18  ;;  %v2051_v18 = vld [vmem:[#allocation6 + $0x4e8] sm:$0xff] }
 0x1f7   :  { %2803 = vmatpush1.bf16.msra.mxu1 %v2802_v13  ;;  %1942 = vmatprep.mubr.f32.mxu1 %v3069_v0  ;;  %v2836_v13 = vpack.c.bf16 %v2049_v11, %v2047_v9 }
 0x1f8   :  { %2805 = vmatprep.subr.bf16.mxu1 %v2804_v14  ;;  %v2046_v14 = vld [vmem:[#allocation6 + $0x4c0] sm:$0xff] }
 0x1f9   :  { %v2838_v21 = vpack.c.bf16 %v2048_v15, %v2046_v14 }
 0x1fb   :  { %2807 = vmatpush1.bf16.msra.mxu1 %v2806_v22  ;;  %v2840_v22 = vpack.c.bf16 %v2053_v20, %v2051_v18 }
 0x1fc   :  { %2809 = vmatprep.subr.bf16.mxu1 %v2808_v23  ;;  %v2050_v23 = vld [vmem:[#allocation6 + $0x4e0] sm:$0xff] }
 0x1fd   :  { %v2842_v27 = vpack.c.bf16 %v2052_v24, %v2050_v23  ;;  %v2357_v23 = vld [vmem:[%s3716_s7 + $0x8] sm:$0xff] }
 0x1ff   :  { %2811 = vmatpush1.bf16.msra.mxu1 %v2810_v29  ;;  %v2844_v29 = vpack.c.bf16 %v2231_v26, %v2230_v25  ;;  %v3071_v25 = vmov 0.0|0.0   ;;  %v2358_v26 = vld [vmem:[%s3716_s7 + $0x10] sm:$0xff] }
 0x200   :  { %2813 = vmatprep.subr.bf16.mxu1 %v2812_v30  ;;  %v2232_v30 = vld [vmem:[%s3714_s5 + $0x10] sm:$0xff] }
 0x201   :  { %v2848_v33 = vpack.c.bf16 %v2233_v32, %v2232_v30  ;;  %v2360_v30 = vld [vmem:[%s3716_s7 + $0x20] sm:$0xff]  ;;  %v2332_v32 = vld [vmem:[%s3715_s6 + $0x8] sm:$0xff] }
 0x202   :  { %1943 = vmatmul.mubr.f32.vlgmr.msra.gmra.mrb[0].mxu1 %v1839_v44  ;;  %v2868_v44 = vpack.c.bf16 %v2243_v43, %v2242_v41 }
 0x203   :  { %2815 = vmatpush1.bf16.msra.mxu1 %v2814_v37  ;;  %1948 = vmatprep.mubr.f32.mxu1 %v3069_v0  ;;  %v2241_v37 = vld [vmem:[%s3714_s5 + $0x58] sm:$0xff] }
 0x204   :  { %2817 = vmatprep.subr.bf16.mxu1 %v2816_v38  ;;  %v2864_v38 = vpack.c.bf16 %v2241_v37, %v2240_v35 }
 0x206   :  { %1949 = vmatmul.mubr.f32.gmra.mrb[2].mxu1 %v1840_v50 }
 0x207   :  { %2819 = vmatpush1.bf16.msra.mxu1 %v2818_v10  ;;  %1954 = vmatprep.mubr.f32.mxu1 %v3069_v0  ;;  %v2872_v10 = vpack.c.bf16 %v2245_v46, %v2244_v45 }
 0x208   :  { %2821 = vmatprep.subr.bf16.mxu1 %v2820_v47 }
 0x20a   :  { %1955 = vmatmul.mubr.f32.gmra.mrb[4].mxu1 %v1841_v57 }
 0x20b   :  { %2823 = vmatpush1.bf16.msra.mxu1 %v2822_v53  ;;  %1960 = vmatprep.mubr.f32.mxu1 %v3069_v0 }
 0x20c   :  { %2825 = vmatprep.subr.bf16.mxu1 %v2824_v54 }
 0x20e   :  { %1961 = vmatmul.mubr.f32.gmra.mrb[6].mxu1 %v1842_v1 }
 0x20f   :  { %2827 = vmatpush1.bf16.msra.mxu1 %v2826_v60  ;;  %1966 = vmatprep.mubr.f32.mxu1 %v3069_v0  ;;  %v2554_v60 = vld [vmem:[%s3713_s4] ss:$0 sm:$0xff] }
 0x210   :  { %2829 = vmatprep.subr.bf16.mxu1 %v2828_v61 }
 0x212   :  { %1967 = vmatmul.mubr.f32.gmra.mrb[8].mxu1 %v1843_v8 }
 0x213   :  { %2831 = vmatpush1.bf16.msra.mxu1 %v2830_v4  ;;  %1972 = vmatprep.mubr.f32.mxu1 %v3069_v0 }
 0x214   :  { %2833 = vmatprep.subr.bf16.mxu1 %v2832_v5 }
 0x216   :  { %1973 = vmatmul.mubr.f32.gmra.mrb[10].mxu1 %v1844_v17 }
 0x217   :  { %2835 = vmatpush1.bf16.msra.mxu1 %v2834_v12  ;;  %2118 = vmatprep.mubr.f32.mxu1 %v3069_v0 }
 0x218   :  { %2837 = vmatprep.subr.bf16.mxu1 %v2836_v13 }
 0x21b   :  { %2839 = vmatpush1.bf16.msra.mxu1 %v2838_v21 }
 0x21c   :  { %2841 = vmatprep.subr.bf16.mxu1 %v2840_v22  ;;  %v2356_v22 = vld [vmem:[%s3716_s7] sm:$0xff] }
 0x21d   :  { %v2877_v24 = vpack.c.bf16 %v2357_v23, %v2356_v22 }
 0x21f   :  { %2843 = vmatpush1.bf16.msra.mxu1 %v2842_v27  ;;  %v2359_v27 = vld [vmem:[%s3716_s7 + $0x18] sm:$0xff] }
 0x220   :  { %2845 = vmatprep.subr.bf16.mxu1 %v2844_v29 }
 0x222   :  { %2119 = vmatmul.mubr.f32.vlgmr.msra.gmra.mrb[0].mxu1 %v3542_v16  ;;  %v2234_v16 = vld [vmem:[%s3714_s5 + $0x20] sm:$0xff] }
 0x223   :  { %2124 = vmatprep.mubr.f32.mxu1 %v3069_v0  ;;  %2847 = vmatpush3.bf16.msra.mxu1 %v2844_v29  ;;  %v2880_v29 = vpack.c.bf16 %v2359_v27, %v2358_v26 }
 0x224   :  { %2849 = vmatprep.subr.bf16.mxu1 %v2848_v33 }
 0x226   :  { %2125 = vmatmul.mubr.f32.gmra.mrb[2].mxu1 %v3549_v28  ;;  %v2235_v28 = vld [vmem:[%s3714_s5 + $0x28] sm:$0xff] }
 0x227   :  { %2130 = vmatprep.mubr.f32.mxu1 %v3069_v0  ;;  %2851 = vmatpush3.bf16.msra.mxu1 %v2848_v33  ;;  %v2852_v36 = vpack.c.bf16 %v2235_v28, %v2234_v16  ;;  %v2331_v33 = vld [vmem:[%s3715_s6] sm:$0xff] }
 0x229   :  { %2853 = vmatprep.subr.bf16.mxu1 %v2852_v36 }
 0x22a   :  { %2131 = vmatmul.mubr.f32.gmra.mrb[4].mxu1 %v1307_v40  ;;  %v2236_v40 = vld [vmem:[%s3714_s5 + $0x30] sm:$0xff] }
 0x22b   :  { %2136 = vmatprep.mubr.f32.mxu1 %v3069_v0  ;;  %2855 = vmatpush3.bf16.msra.mxu1 %v2852_v36 }
 0x22e   :  { %2137 = vmatmul.mubr.f32.gmra.mrb[6].mxu1 %v3566_v19  ;;  %v2237_v19 = vld [vmem:[%s3714_s5 + $0x38] sm:$0xff] }
 0x22f   :  { %2142 = vmatprep.mubr.f32.mxu1 %v3069_v0 }
 0x232   :  { %2143 = vmatmul.mubr.f32.gmra.mrb[8].mxu1 %v3573_v31  ;;  %v2856_v31 = vpack.c.bf16 %v2237_v19, %v2236_v40 }
 0x233   :  { %2148 = vmatprep.mubr.f32.mxu1 %v3069_v0 }
 0x234   :  { %2857 = vmatprep.subr.bf16.mxu1 %v2856_v31 }
 0x235   :  { %2859 = vmatpush3.bf16.msra.mxu1 %v2856_v31 }
 0x236   :  { %2149 = vmatmul.mubr.f32.gmra.mrb[10].mxu1 %v1312_v42  ;;  %v2239_v42 = vld [vmem:[%s3714_s5 + $0x48] sm:$0xff] }
 0x237   :  { %v2860_v34 = vpack.c.bf16 %v2239_v42, %v2238_v39 }
 0x239   :  { %2861 = vmatprep.subr.bf16.mxu1 %v2860_v34 }
 0x23a   :  { %2863 = vmatpush3.bf16.msra.mxu1 %v2860_v34 }
 0x23b   :  { %2865 = vmatprep.subr.bf16.mxu1 %v2864_v38 }
 0x23e   :  { %2867 = vmatpush3.bf16.msra.mxu1 %v2864_v38 }
 0x23f   :  { %2869 = vmatprep.subr.bf16.mxu1 %v2868_v44 }
 0x242   :  { %2871 = vmatpush3.bf16.msra.mxu1 %v2868_v44 }
 0x243   :  { %2873 = vmatprep.subr.bf16.mxu1 %v2872_v10 }
 0x246   :  { %2875 = vmatpush3.bf16.msra.mxu1 %v2872_v10 }
 0x247   :  { %2876 = vmatprep.subr.bf16.mxu1 %v3071_v25 }
 0x2f5   :  { %v2120_v47 = vpop.f32.mrb[0].mxu1 }
 0x2f6   :  { %v2122_v48 = vpop.f32.mrb[1].mxu1 }
 0x2f7   :  { %v2191_v49 = vmax.f32 %v2120_v47, %v2122_v48 }
 0x2f9   :  { %2197 = vst [vmem:[#allocation5] sm:$0xff] %v2191_v49  ;;  %v2126_v50 = vpop.f32.mrb[2].mxu1 }
 0x2fa   :  { %v2128_v51 = vpop.f32.mrb[3].mxu1 }
 0x2fb   :  { %v2192_v52 = vmax.f32 %v2126_v50, %v2128_v51 }
 0x2fd   :  { %2198 = vst [vmem:[#allocation5 + $0x8] sm:$0xff] %v2192_v52  ;;  %v2132_v53 = vpop.f32.mrb[4].mxu1 }
 0x2fe   :  { %v2134_v54 = vpop.f32.mrb[5].mxu1 }
 0x2ff   :  { %v2193_v55 = vmax.f32 %v2132_v53, %v2134_v54 }
 0x301   :  { %2199 = vst [vmem:[#allocation5 + $0x10] sm:$0xff] %v2193_v55  ;;  %v2138_v56 = vpop.f32.mrb[6].mxu1  ;;  %v2555_v55 = vld [vmem:[%s3717_s8] ss:$0 sm:$0xff] }
 0x302   :  { %v2140_v57 = vpop.f32.mrb[7].mxu1 }
 0x303   :  { %v2194_v58 = vmax.f32 %v2138_v56, %v2140_v57 }
 0x304   :  { %v2207_v59 = vld [vmem:[#allocation5 + $0x2] sm:$0xff] }
 0x305   :  { %2200 = vst [vmem:[#allocation5 + $0x18] sm:$0xff] %v2194_v58  ;;  %v2144_v61 = vpop.f32.mrb[8].mxu1  ;;  %v2211_v62 = vmax.f32 %v2191_v49, %v2207_v59 }
 0x306   :  { %v2146_v63 = vpop.f32.mrb[9].mxu1 }
 0x307   :  { %v2195_v1 = vmax.f32 %v2144_v61, %v2146_v63  ;;  %v2222_v2 = vadd.f32 %v2554_v60, %v2211_v62 }
 0x308   :  { %v2208_v3 = vld [vmem:[#allocation5 + $0xa] sm:$0xff] }
 0x309   :  { %2201 = vst [vmem:[#allocation5 + $0x20] sm:$0xff] %v2195_v1  ;;  %v2150_v4 = vpop.f32.mrb[10].mxu1  ;;  %v2226_v5 = vmax.f32 %v2222_v2, 0.0  ;;  %v2212_v6 = vmax.f32 %v2192_v52, %v2208_v3 }
 0x30a   :  { %v2152_v7 = vpop.f32.mrb[11].mxu1 }
 0x30b   :  { %v2196_v8 = vmax.f32 %v2150_v4, %v2152_v7  ;;  %2615 = vmatprep.mubr.f32.mxu1 %v2226_v5  ;;  %v2223_v9 = vadd.f32 %v2554_v60, %v2212_v6 }
 0x30d   :  { %2202 = vst [vmem:[#allocation5 + $0x28] sm:$0xff] %v2196_v8  ;;  %v2227_v11 = vmax.f32 %v2223_v9, 0.0 }
 0x30f   :  { %2616 = vmatmul.mubr.f32.vlgmr.msra.gmra.mrb[12].mxu1 %v2227_v11 }
 0x310   :  { %v2209_v12 = vld [vmem:[#allocation5 + $0x1a] sm:$0xff]  ;;  %2878 = vmatpush3.bf16.msra.mxu1 %v2877_v24 }
 0x311   :  { %v2213_v13 = vmax.f32 %v2194_v58, %v2209_v12  ;;  %2879 = vmatprep.subr.bf16.mxu1 %v3071_v25 }
 0x313   :  { %v2224_v14 = vadd.f32 %v2554_v60, %v2213_v13 }
 0x314   :  { %v2210_v15 = vld [vmem:[#allocation5 + $0x22] sm:$0xff]  ;;  %2881 = vmatpush3.bf16.msra.mxu1 %v2880_v29 }
 0x315   :  { %v2228_v17 = vmax.f32 %v2224_v14, 0.0  ;;  %v2214_v18 = vmax.f32 %v2195_v1, %v2210_v15  ;;  %2629 = vmatprep.subr.mxu1 %v3069_v0 }
 0x317   :  { %2618 = vmatprep.mubr.f32.mxu1 %v2228_v17  ;;  %v2225_v20 = vadd.f32 %v2554_v60, %v2214_v18 }
 0x318   :  { %2630 = vmatpush3.msra.mxu1 %v2360_v30 }
 0x319   :  { %v2229_v21 = vmax.f32 %v2225_v20, 0.0 }
 0x31b   :  { %2619 = vmatmul.mubr.f32.gmra.mrb[14].mxu1 %v2229_v21 }
 0x31c   :  { %2631 = vmatprep.mubr.msk.f32.mxu1 %vm3072_vm5, %v3069_v0 }
 0x3e2   :  { %v2617_v16 = vpop.f32.mrb[12].mxu1 }
 0x3e3   :  { %v2334_v28 = vmul.f32 %v2617_v16, %v2332_v32  ;;  %v2312_v36 = vpop.f32.mrb[13].mxu1 }
 0x3e4   :  { %v2333_v40 = vmul.f32 %v2331_v33, %v2312_v36 }
 0x3e5   :  { %v2339_v19 = vsel %vm2337_vm6, %v2334_v28, 0.0 }
 0x3e6   :  { %v2338_v31 = vsel %vm2337_vm6, %v2333_v40, 0.0 }
 0x3e7   :  { %v2340_v39 = vadd.f32 %v2339_v19, %v2338_v31 }
 0x3e9   :  { %v2341_v0 = vrot.slane %v2340_v39, 4 }
 0x3eb   :  { %v2342_v34 = vadd.f32 %v2341_v0, %v2340_v39 }
 0x3ed   :  { %v2343_v44 = vrot.slane %v2342_v34, 2 }
 0x3ee   :  { %v2620_v42 = vpop.f32.mrb[14].mxu1 }
 0x3ef   :  { %v2336_v35 = vmul.f32 %v2620_v42, %v2332_v32  ;;  %v2322_v37 = vpop.f32.mrb[15].mxu1  ;;  %v2344_v10 = vadd.f32 %v2343_v44, %v2342_v34 }
 0x3f0   :  { %v2335_v38 = vmul.f32 %v2331_v33, %v2322_v37 }
 0x3f1   :  { %v2348_v41 = vsel %vm2337_vm6, %v2336_v35, 0.0  ;;  %v2345_v49 = vrot.slane %v2344_v10, 1 }
 0x3f2   :  { %v2347_v43 = vsel %vm2337_vm6, %v2335_v38, 0.0 }
 0x3f3   :  { %v2349_v45 = vadd.f32 %v2348_v41, %v2347_v43  ;;  %v2346_v52 = vadd.f32 %v2345_v49, %v2344_v10 }
 0x3f5   :  { %v2350_v46 = vrot.slane %v2349_v45, 4 }
 0x3f7   :  { %v2351_v47 = vadd.f32 %v2350_v46, %v2349_v45 }
 0x3f9   :  { %v2352_v48 = vrot.slane %v2351_v47, 2 }
 0x3fb   :  { %v2353_v50 = vadd.f32 %v2352_v48, %v2351_v47 }
 0x3fd   :  { %v2354_v51 = vrot.slane %v2353_v50, 1 }
 0x3ff   :  { %v2355_v53 = vadd.f32 %v2354_v51, %v2353_v50 }
 0x401   :  { %v2371_v54 = vsel %vm2370_vm7, %v2355_v53, %v2346_v52 }
 0x402   :  { %2632 = vmatmul.mubr.msk.f32.vlgmr.msra.gmra.mrb[16].mxu1 %vm2337_vm6, %v2371_v54 }
 0x4d5   :  { %v2440_v56 = vpop.f32.mrb[16].mxu1 }
 0x4d6   :  { %v2441_v57 = vadd.f32 %v2555_v55, %v2440_v56  ;;  %v2633_v58 = vpop.f32.mrb[17].mxu1 }
 0x4d8   :  { %2445 = vst.msk [vmem:[#allocation9] sm:$0x3] %vm2444_vm8, %v2441_v57 }
 0x4d9   :  { %3051 = shalt.err (!%p3048_p12)
}
 0x4da   :  { %s3052_s26 = scalar_lea.hbm %s3718_s9, 32 }
 0x4db   :  { %p3053_p13 = scmp.ne.s32.totalorder %s3718_s9, %s3052_s26  ;;  %p3056_p0 = scmp.lt.u32.totalorder %s3052_s26, %s3718_s9 }
 0x4dd   :  { %p3058_p1 = pnand %p3056_p0, %p3053_p13 }
 0x4df   :  { %3061 = shalt.err (!%p3058_p1)
}
 0x4e0   :  { %2455 = dma.vmem_to_hbm [thread:$0]  %s2453_s24, 32, %s3718_s9, [#allocation8]  }
 0x4e1   :  { %3064 = dma.done.wait [#allocation8], 32  }
 0x4e2   :  { %3065 = vsyncadd [#allocation8], 4294967264 }
 0x4e3   :  { %2459 = vsyncpa [#allocation7], 1 }
 0x4e4   :  { %2460 = vsyncpa [#allocation8], 1 }

</bundles_post_ra>
